<compile_context>
chip_gen: v5e
topology: v5e:2x2
jax: 0.10.0
libtpu: 0.0.40
codegen_flags: <defaults>
</compile_context>

<pallas_src>
import jax
import jax.numpy as jnp
from jax.experimental import pallas as pl
from jax.experimental.pallas import tpu as pltpu

NUM_CLASSES = 7
IN_FEATS = 1408        # efficientnet_b2 classifier[1].in_features
H1 = 512
H2 = 128
OUT_PAD = 128          # pad the 7-class output to a lane-dense 128 slab
TB_MAX = 512           # max batch rows per grid step (f32 x tile ~2.75 MB)
TARGET_STEPS = 4       # aim for >=4 grid steps (pipelining + both v7x TCs)


def _round_up(n, m):
    return ((n + m - 1) // m) * m


def head_kernel(x_ref, w1_ref, b1_ref, w2_ref, b2_ref, w3_ref, b3_ref, o_ref):
    """Fused MLP head: relu(x@W1+b1) -> relu(.@W2+b2) -> .@W3+b3.

    x arrives in its HBM dtype (f32 from the backbone) and is cast to bf16
    in-kernel; matmuls accumulate in f32; bias-add + ReLU in f32.
    """
    x = x_ref[...].astype(jnp.bfloat16)                                  # [TB, 1408]
    h1 = jnp.dot(x, w1_ref[...], preferred_element_type=jnp.float32)    # [TB, 512]
    h1 = jnp.maximum(h1 + b1_ref[...], 0.0).astype(jnp.bfloat16)
    h2 = jnp.dot(h1, w2_ref[...], preferred_element_type=jnp.float32)   # [TB, 128]
    h2 = jnp.maximum(h2 + b2_ref[...], 0.0).astype(jnp.bfloat16)
    o = jnp.dot(h2, w3_ref[...], preferred_element_type=jnp.float32)    # [TB, 128] padded
    o_ref[...] = (o + b3_ref[...]).astype(o_ref.dtype)


def prepare_params(w1, b1, w2, b2, w3, b3):
    """One-time parameter prep (outside the per-call forward): bf16 weights,
    f32 row-vector biases, w3/b3 zero-padded to 128 output lanes."""
    w3_pad = jnp.zeros((H2, OUT_PAD), jnp.float32).at[:, :NUM_CLASSES].set(w3)
    b3_pad = jnp.zeros((1, OUT_PAD), jnp.float32).at[:, :NUM_CLASSES].set(b3)
    return (
        w1.astype(jnp.bfloat16), b1.reshape(1, H1).astype(jnp.float32),
        w2.astype(jnp.bfloat16), b2.reshape(1, H2).astype(jnp.float32),
        w3_pad.astype(jnp.bfloat16), b3_pad.astype(jnp.float32),
    )


def _pick_batch_tile(B):
    """Batch tile: full batch for tiny B (block == array dim, always legal);
    otherwise a multiple of 16, sized so B/TARGET_STEPS <= tb <= TB_MAX."""
    if B <= 8:
        return B
    tb = _round_up(pl.cdiv(B, TARGET_STEPS), 16)
    return max(16, min(TB_MAX, tb))


@jax.jit
def efficientnet_b0_head(x, w1, b1, w2, b2, w3_pad, b3_pad):
    """x: [B, IN_FEATS] backbone features (f32 or bf16).  Params pre-prepped
    via prepare_params.  Returns [B, NUM_CLASSES] f32 logits."""
    B = x.shape[0]
    tb = _pick_batch_tile(B)
    grid = (pl.cdiv(B, tb),)   # ragged last tile; masked store handles the edge

    out_pad = pl.pallas_call(
        head_kernel,
        out_shape=jax.ShapeDtypeStruct((B, OUT_PAD), jnp.bfloat16),
        grid_spec=pltpu.PrefetchScalarGridSpec(
            num_scalar_prefetch=0,
            grid=grid,
            in_specs=[
                pl.BlockSpec((tb, IN_FEATS), lambda i: (i, 0)),   # x tile (f32, cast in-kernel)
                pl.BlockSpec((IN_FEATS, H1), lambda i: (0, 0)),   # w1 (VMEM-resident)
                pl.BlockSpec((1, H1), lambda i: (0, 0)),          # b1
                pl.BlockSpec((H1, H2), lambda i: (0, 0)),         # w2
                pl.BlockSpec((1, H2), lambda i: (0, 0)),          # b2
                pl.BlockSpec((H2, OUT_PAD), lambda i: (0, 0)),    # w3 (padded)
                pl.BlockSpec((1, OUT_PAD), lambda i: (0, 0)),     # b3 (padded)
            ],
            out_specs=pl.BlockSpec((tb, OUT_PAD), lambda i: (i, 0)),
        ),
        compiler_params=pltpu.CompilerParams(
            dimension_semantics=("parallel",),
            vmem_limit_bytes=32 << 20,
        ),
    )(x, w1, b1, w2, b2, w3_pad, b3_pad)

    return out_pad[:, :NUM_CLASSES].astype(jnp.float32)


def init_params(key):
    """Deterministic init matching nn.Linear shapes (weights stored as (in, out))."""
    ks = jax.random.split(key, 6)

    def linear(kw, kb, fan_in, fan_out):
        bound = 1.0 / jnp.sqrt(jnp.float32(fan_in))
        w = jax.random.uniform(kw, (fan_in, fan_out), jnp.float32, -bound, bound)
        b = jax.random.uniform(kb, (fan_out,), jnp.float32, -bound, bound)
        return w, b

    w1, b1 = linear(ks[0], ks[1], IN_FEATS, H1)
    w2, b2 = linear(ks[2], ks[3], H1, H2)
    w3, b3 = linear(ks[4], ks[5], H2, NUM_CLASSES)
    return w1, b1, w2, b2, w3, b3


def reference(x, w1, b1, w2, b2, w3, b3):
    h1 = jnp.maximum(x @ w1 + b1, 0.0)
    h2 = jnp.maximum(h1 @ w2 + b2, 0.0)
    return h2 @ w3 + b3


if __name__ == "__main__":
    key = jax.random.PRNGKey(0)
    k_x, k_p = jax.random.split(key)

    B = 8
    x = jax.random.normal(k_x, (B, IN_FEATS), jnp.float32)  # backbone features
    raw_params = init_params(k_p)
    params = prepare_params(*raw_params)

    out = efficientnet_b0_head(x, *params)
    out = jax.block_until_ready(out)

    ref = reference(x, *raw_params)
    assert out.shape == (B, NUM_CLASSES), out.shape
    # bf16 weights/activations/output (f32 accumulation) => loose tolerance vs f32 ref.
    assert jnp.allclose(out, ref, atol=5e-2, rtol=5e-2), float(jnp.max(jnp.abs(out - ref)))

    print("KERNEL_OK")
</pallas_src>

<mosaic_0001>
module attributes {stable_mosaic.version = 11 : i64} {
  func.func @head_kernel(%arg0: i32, %arg1: memref<8x1408xf32, #tpu.memory_space<vmem>>, %arg2: memref<1408x512xbf16, #tpu.memory_space<vmem>>, %arg3: memref<1x512xf32, #tpu.memory_space<vmem>>, %arg4: memref<512x128xbf16, #tpu.memory_space<vmem>>, %arg5: memref<1x128xf32, #tpu.memory_space<vmem>>, %arg6: memref<128x128xbf16, #tpu.memory_space<vmem>>, %arg7: memref<1x128xf32, #tpu.memory_space<vmem>>, %arg8: memref<8x128xbf16, #tpu.memory_space<vmem>>) attributes {dimension_semantics = [#tpu.dimension_semantics<parallel>], iteration_bounds = array<i64: 1>, scalar_prefetch = 0 : i64, scratch_operands = 0 : i64, tpu.core_type = #tpu.core_type<tc>, window_params = [{transform_indices = @transform_0, window_bounds = array<i64: 8, 1408>}, {pipeline_mode = #tpu.pipeline_mode<synchronous>, transform_indices = @transform_1, window_bounds = array<i64: 1408, 512>}, {pipeline_mode = #tpu.pipeline_mode<synchronous>, transform_indices = @transform_2, window_bounds = array<i64: 1, 512>}, {pipeline_mode = #tpu.pipeline_mode<synchronous>, transform_indices = @transform_3, window_bounds = array<i64: 512, 128>}, {pipeline_mode = #tpu.pipeline_mode<synchronous>, transform_indices = @transform_4, window_bounds = array<i64: 1, 128>}, {pipeline_mode = #tpu.pipeline_mode<synchronous>, transform_indices = @transform_5, window_bounds = array<i64: 128, 128>}, {pipeline_mode = #tpu.pipeline_mode<synchronous>, transform_indices = @transform_6, window_bounds = array<i64: 1, 128>}, {transform_indices = @transform_7, window_bounds = array<i64: 8, 128>}]} {
    %c0 = arith.constant 0 : index
    %c0_0 = arith.constant 0 : index
    %0 = vector.load %arg1[%c0, %c0_0] : memref<8x1408xf32, #tpu.memory_space<vmem>>, vector<8x1408xf32>
    %1 = arith.truncf %0 : vector<8x1408xf32> to vector<8x1408xbf16>
    %c0_1 = arith.constant 0 : index
    %c0_2 = arith.constant 0 : index
    %2 = vector.load %arg2[%c0_1, %c0_2] : memref<1408x512xbf16, #tpu.memory_space<vmem>>, vector<1408x512xbf16>
    %cst = arith.constant dense<0.000000e+00> : vector<8x512xf32>
    %3 = tpu.matmul %1, %2, %cst {dimension_numbers = #tpu.dot_dimension_numbers<[1], [0], [0], [1], [0, 0, 1, 1], [], []>} : vector<8x1408xbf16>, vector<1408x512xbf16>, vector<8x512xf32> -> vector<8x512xf32>
    %c0_3 = arith.constant 0 : index
    %c0_4 = arith.constant 0 : index
    %4 = vector.load %arg3[%c0_3, %c0_4] : memref<1x512xf32, #tpu.memory_space<vmem>>, vector<1x512xf32>
    %5 = vector.broadcast %4 : vector<1x512xf32> to vector<8x512xf32>
    %6 = arith.addf %3, %5 : vector<8x512xf32>
    %cst_5 = arith.constant 0.000000e+00 : f32
    %7 = vector.broadcast %cst_5 : f32 to vector<8x512xf32>
    %8 = arith.maximumf %6, %7 : vector<8x512xf32>
    %9 = arith.truncf %8 : vector<8x512xf32> to vector<8x512xbf16>
    %c0_6 = arith.constant 0 : index
    %c0_7 = arith.constant 0 : index
    %10 = vector.load %arg4[%c0_6, %c0_7] : memref<512x128xbf16, #tpu.memory_space<vmem>>, vector<512x128xbf16>
    %cst_8 = arith.constant dense<0.000000e+00> : vector<8x128xf32>
    %11 = tpu.matmul %9, %10, %cst_8 {dimension_numbers = #tpu.dot_dimension_numbers<[1], [0], [0], [1], [0, 0, 1, 1], [], []>} : vector<8x512xbf16>, vector<512x128xbf16>, vector<8x128xf32> -> vector<8x128xf32>
    %c0_9 = arith.constant 0 : index
    %c0_10 = arith.constant 0 : index
    %12 = vector.load %arg5[%c0_9, %c0_10] : memref<1x128xf32, #tpu.memory_space<vmem>>, vector<1x128xf32>
    %13 = vector.broadcast %12 : vector<1x128xf32> to vector<8x128xf32>
    %14 = arith.addf %11, %13 : vector<8x128xf32>
    %cst_11 = arith.constant 0.000000e+00 : f32
    %15 = vector.broadcast %cst_11 : f32 to vector<8x128xf32>
    %16 = arith.maximumf %14, %15 : vector<8x128xf32>
    %17 = arith.truncf %16 : vector<8x128xf32> to vector<8x128xbf16>
    %c0_12 = arith.constant 0 : index
    %c0_13 = arith.constant 0 : index
    %18 = vector.load %arg6[%c0_12, %c0_13] : memref<128x128xbf16, #tpu.memory_space<vmem>>, vector<128x128xbf16>
    %cst_14 = arith.constant dense<0.000000e+00> : vector<8x128xf32>
    %19 = tpu.matmul %17, %18, %cst_14 {dimension_numbers = #tpu.dot_dimension_numbers<[1], [0], [0], [1], [0, 0, 1, 1], [], []>} : vector<8x128xbf16>, vector<128x128xbf16>, vector<8x128xf32> -> vector<8x128xf32>
    %c0_15 = arith.constant 0 : index
    %c0_16 = arith.constant 0 : index
    %20 = vector.load %arg7[%c0_15, %c0_16] : memref<1x128xf32, #tpu.memory_space<vmem>>, vector<1x128xf32>
    %21 = vector.broadcast %20 : vector<1x128xf32> to vector<8x128xf32>
    %22 = arith.addf %19, %21 : vector<8x128xf32>
    %23 = arith.truncf %22 : vector<8x128xf32> to vector<8x128xbf16>
    %c0_17 = arith.constant 0 : index
    %c0_18 = arith.constant 0 : index
    %24 = vector.load %arg8[%c0_17, %c0_18] : memref<8x128xbf16, #tpu.memory_space<vmem>>, vector<8x128xbf16>
    tpu.vector_store %arg8[%c0_17, %c0_18], %23 {strides = array<i32>} : memref<8x128xbf16, #tpu.memory_space<vmem>>, vector<8x128xbf16>,
    return
  }
  func.func @transform_0(%arg0: i32) -> (i32, i32) {
    %c0_i32 = arith.constant 0 : i32
    %c0_i32_0 = arith.constant 0 : i32
    return %arg0, %c0_i32 : i32, i32
  }
  func.func @transform_1(%arg0: i32) -> (i32, i32) {
    %c0_i32 = arith.constant 0 : i32
    %c0_i32_0 = arith.constant 0 : i32
    %c0_i32_1 = arith.constant 0 : i32
    return %c0_i32, %c0_i32_0 : i32, i32
  }
  func.func @transform_2(%arg0: i32) -> (i32, i32) {
    %c0_i32 = arith.constant 0 : i32
    %c0_i32_0 = arith.constant 0 : i32
    %c0_i32_1 = arith.constant 0 : i32
    return %c0_i32, %c0_i32_0 : i32, i32
  }
  func.func @transform_3(%arg0: i32) -> (i32, i32) {
    %c0_i32 = arith.constant 0 : i32
    %c0_i32_0 = arith.constant 0 : i32
    %c0_i32_1 = arith.constant 0 : i32
    return %c0_i32, %c0_i32_0 : i32, i32
  }
  func.func @transform_4(%arg0: i32) -> (i32, i32) {
    %c0_i32 = arith.constant 0 : i32
    %c0_i32_0 = arith.constant 0 : i32
    %c0_i32_1 = arith.constant 0 : i32
    return %c0_i32, %c0_i32_0 : i32, i32
  }
  func.func @transform_5(%arg0: i32) -> (i32, i32) {
    %c0_i32 = arith.constant 0 : i32
    %c0_i32_0 = arith.constant 0 : i32
    %c0_i32_1 = arith.constant 0 : i32
    return %c0_i32, %c0_i32_0 : i32, i32
  }
  func.func @transform_6(%arg0: i32) -> (i32, i32) {
    %c0_i32 = arith.constant 0 : i32
    %c0_i32_0 = arith.constant 0 : i32
    %c0_i32_1 = arith.constant 0 : i32
    return %c0_i32, %c0_i32_0 : i32, i32
  }
  func.func @transform_7(%arg0: i32) -> (i32, i32) {
    %c0_i32 = arith.constant 0 : i32
    %c0_i32_0 = arith.constant 0 : i32
    return %arg0, %c0_i32 : i32, i32
  }
}

</mosaic_0001>

<bundles_post_ra>
// kernel: efficientnet_b0_head.1
= control target key start
LH: loop header
LB: loop body
LE: loop exit
PB: predicated region body
PF: predicated region fallthrough
CT: control target
= control target key end

     0   :  { %12 = vsyncpa [#allocation3], 0  ;;  %s5581_s0 = inlined_call_operand.hbm [shape: f32[8,1408], index: 0, kind: input, shape index: {}]   ;;  %s5582_s1 = inlined_call_operand.hbm [shape: bf16[1408,512], index: 1, kind: input, shape index: {}]   ;;  %s5583_s2 = inlined_call_operand.hbm [shape: f32[1,512], index: 2, kind: input, shape index: {}]   ;;  %s5584_s3 = inlined_call_operand.hbm [shape: bf16[512,128], index: 3, kind: input, shape index: {}]   ;;  %s5585_s4 = inlined_call_operand.hbm [shape: f32[1,128], index: 4, kind: input, shape index: {}]   ;;  %s5586_s5 = inlined_call_operand.hbm [shape: bf16[128,128], index: 5, kind: input, shape index: {}]   ;;  %s5587_s6 = inlined_call_operand.hbm [shape: f32[1,128], index: 6, kind: input, shape index: {}]   ;;  %s5588_s7 = inlined_call_operand.vmem [shape: bf16[8,128], index: 7, kind: output, shape index: {}]  }
   0x1   :  { %13 = vsyncpa [#allocation5], 0 }
   0x2   :  { %14 = vsyncpa [#allocation8], 0  ;;  %s31_s26 = sshll.u32 %s5582_s1, 4  ;;  %s32_s26 = int_to_ptr.hbm [resolvable:$true] %s31_s26 }
   0x3   :  { %15 = vsyncpa [#allocation11], 0  ;;  %s5406_s27 = smov [#allocation4]   ;;  %s55_s8 = sshll.u32 %s5584_s3, 4  ;;  %s56_s8 = int_to_ptr.hbm [resolvable:$true] %s55_s8 }
   0x4   :  { %s33_s28 = sshll.u32 %s5406_s27, 4  ;;  %s5407_s9 = smov 256   ;;  %s34_s28 = int_to_ptr.vmem [resolvable:$true] %s33_s28 }
   0x5   :  { %s5408_s10 = smov 16   ;;  %s5409_s11 = smov [#allocation7]  }
   0x6   :  { %39 = dma.hbm_to_vmem [thread:$0]  %s32_s26, 45056, %s34_s28, [#allocation5], %s5407_s9, %s5407_s9, %s5408_s10  }
   0x7   :  { %s57_s12 = sshll.u32 %s5409_s11, 4  ;;  %s5410_s13 = smov 64   ;;  %s58_s12 = int_to_ptr.vmem [resolvable:$true] %s57_s12 }
   0x8   :  { %s5411_s14 = smov 4   ;;  %s79_s16 = sshll.u32 %s5586_s5, 4  ;;  %s80_s16 = int_to_ptr.hbm [resolvable:$true] %s79_s16 }
   0x9   :  { %63 = dma.hbm_to_vmem [thread:$0]  %s56_s8, 4096, %s58_s12, [#allocation8], %s5410_s13, %s5410_s13, %s5411_s14  }
   0xa   :  { %s5412_s17 = smov [#allocation10]   ;;  %s21_s20 = sshll.u32 %s5581_s0, 4  ;;  %s22_s20 = int_to_ptr.hbm [resolvable:$true] %s21_s20 }
   0xb   :  { %s81_s18 = sshll.u32 %s5412_s17, 4  ;;  %s5413_s21 = smov [#allocation2]   ;;  %s82_s18 = int_to_ptr.vmem [resolvable:$true] %s81_s18 }
   0xc   :  { %87 = dma.hbm_to_vmem [thread:$0]  %s80_s16, 1024, %s82_s18, [#allocation11], %s5410_s13, %s5410_s13, %s5411_s14  }
   0xd   :  { %s23_s22 = sshll.u32 %s5413_s21, 4  ;;  %s45_s25 = sshll.u32 %s5583_s2, 4  ;;  %s24_s22 = int_to_ptr.vmem [resolvable:$true] %s23_s22  ;;  %s46_s25 = int_to_ptr.hbm [resolvable:$true] %s45_s25 }
   0xe   :  { %26 = dma.hbm_to_vmem [thread:$0]  %s22_s20, 1408, %s24_s22, [#allocation3]  }
   0xf   :  { %s69_s27 = sshll.u32 %s5585_s4, 4  ;;  %s5414_s28 = smov [#allocation6]   ;;  %s70_s27 = int_to_ptr.hbm [resolvable:$true] %s69_s27 }
  0x10   :  { %s47_s29 = sshll.u32 %s5414_s28, 4  ;;  %s5415_s0 = smov [#allocation9]   ;;  %s48_s29 = int_to_ptr.vmem [resolvable:$true] %s47_s29 }
  0x11   :  { %50 = dma.hbm_to_vmem [thread:$0]  %s46_s25, 64, %s48_s29, [#allocation5]  }
  0x12   :  { %s71_s30 = sshll.u32 %s5415_s0, 4  ;;  %s93_s10 = sshll.u32 %s5587_s6, 4  ;;  %s72_s30 = int_to_ptr.vmem [resolvable:$true] %s71_s30  ;;  %s94_s10 = int_to_ptr.hbm [resolvable:$true] %s93_s10 }
  0x13   :  { %74 = dma.hbm_to_vmem [thread:$0]  %s70_s27, 16, %s72_s30, [#allocation8]  }
  0x14   :  { %s5416_s2 = smov [#allocation12]  }
  0x15   :  { %s95_s11 = sshll.u32 %s5416_s2, 4  ;;  %s96_s11 = int_to_ptr.vmem [resolvable:$true] %s95_s11 }
  0x16   :  { %98 = dma.hbm_to_vmem [thread:$0]  %s94_s10, 16, %s96_s11, [#allocation11]  }
  0x17   :  { %5398 = dma.done.wait [#allocation3], 1408  }
  0x18   :  { %5399 = vsyncadd [#allocation3], 4294965888 }
  0x19   :  { %5400 = dma.done.wait [#allocation5], 45120  }
  0x1a   :  { %5401 = vsyncadd [#allocation5], 4294922176 }
  0x1b   :  { %5402 = dma.done.wait [#allocation8], 4112  }
  0x1c   :  { %5403 = vsyncadd [#allocation8], 4294963184 }
  0x1d   :  { %5404 = dma.done.wait [#allocation11], 1040  }
  0x1e   :  { %5405 = vsyncadd [#allocation11], 4294966256  ;;  %v3370_v0 = vld [vmem:[#allocation4 + $0xe0] sm:$0xf]  ;;  %v4854_v1 = vld [vmem:[#allocation4 + $0xec] sm:$0xf0] }
  0x1f   :  { %v3498_v2 = vld [vmem:[#allocation4 + $0x1e0] sm:$0xf]  ;;  %v3371_v3 = vor.u32 %v4854_v1, %v3370_v0  ;;  %v4886_v4 = vld [vmem:[#allocation4 + $0x1ec] sm:$0xf0] }
  0x20   :  { %v3626_v5 = vld [vmem:[#allocation4 + $0x2e0] sm:$0xf]  ;;  %v4918_v6 = vld [vmem:[#allocation4 + $0x2ec] sm:$0xf0]  ;;  %v3499_v7 = vor.u32 %v4886_v4, %v3498_v2 }
  0x21   :  { %v3627_v8 = vor.u32 %v4918_v6, %v3626_v5  ;;  %v3754_v9 = vld [vmem:[#allocation4 + $0x3e0] sm:$0xf]  ;;  %v4950_v10 = vld [vmem:[#allocation4 + $0x3ec] sm:$0xf0]  ;;  %2271 = vmatpush.bf16.msra.mxu0 %v3371_v3 }
  0x22   :  { %v3354_v11 = vld [vmem:[#allocation4 + $0xc0] sm:$0xf]  ;;  %v3755_v12 = vor.u32 %v4950_v10, %v3754_v9  ;;  %v4850_v13 = vld [vmem:[#allocation4 + $0xcc] sm:$0xf0]  ;;  %2284 = vmatpush.bf16.msra.mxu1 %v3499_v7 }
  0x23   :  { %v3482_v14 = vld [vmem:[#allocation4 + $0x1c0] sm:$0xf]  ;;  %v4882_v15 = vld [vmem:[#allocation4 + $0x1cc] sm:$0xf0]  ;;  %2297 = vmatpush.bf16.msra.mxu2 %v3627_v8  ;;  %v3355_v16 = vor.u32 %v4850_v13, %v3354_v11 }
  0x24   :  { %v3483_v17 = vor.u32 %v4882_v15, %v3482_v14  ;;  %v3610_v18 = vld [vmem:[#allocation4 + $0x2c0] sm:$0xf]  ;;  %v4914_v19 = vld [vmem:[#allocation4 + $0x2cc] sm:$0xf0]  ;;  %2310 = vmatpush.bf16.msra.mxu3 %v3755_v12 }
  0x25   :  { %v3738_v20 = vld [vmem:[#allocation4 + $0x3c0] sm:$0xf]  ;;  %v3611_v21 = vor.u32 %v4914_v19, %v3610_v18  ;;  %v4946_v22 = vld [vmem:[#allocation4 + $0x3cc] sm:$0xf0]  ;;  %2272 = vmatpush.bf16.msra.mxu0 %v3355_v16 }
  0x26   :  { %v3338_v23 = vld [vmem:[#allocation4 + $0xa0] sm:$0xf]  ;;  %v4846_v24 = vld [vmem:[#allocation4 + $0xac] sm:$0xf0]  ;;  %v3739_v25 = vor.u32 %v4946_v22, %v3738_v20  ;;  %2285 = vmatpush.bf16.msra.mxu1 %v3483_v17 }
  0x27   :  { %v3466_v26 = vld [vmem:[#allocation4 + $0x1a0] sm:$0xf]  ;;  %v4878_v27 = vld [vmem:[#allocation4 + $0x1ac] sm:$0xf0]  ;;  %v3339_v29 = vor.u32 %v4846_v24, %v3338_v23  ;;  %2298 = vmatpush.bf16.msra.mxu2 %v3611_v21 }
  0x28   :  { %v3594_v28 = vld [vmem:[#allocation4 + $0x2a0] sm:$0xf]  ;;  %v4910_v30 = vld [vmem:[#allocation4 + $0x2ac] sm:$0xf0]  ;;  %v3467_v33 = vor.u32 %v4878_v27, %v3466_v26  ;;  %2311 = vmatpush.bf16.msra.mxu3 %v3739_v25 }
  0x29   :  { %v3722_v31 = vld [vmem:[#allocation4 + $0x3a0] sm:$0xf]  ;;  %v4942_v32 = vld [vmem:[#allocation4 + $0x3ac] sm:$0xf0]  ;;  %v3595_v34 = vor.u32 %v4910_v30, %v3594_v28  ;;  %2273 = vmatpush.bf16.msra.mxu0 %v3339_v29 }
  0x2a   :  { %v3322_v35 = vld [vmem:[#allocation4 + $0x80] sm:$0xf]  ;;  %v4842_v36 = vld [vmem:[#allocation4 + $0x8c] sm:$0xf0]  ;;  %v3723_v38 = vor.u32 %v4942_v32, %v3722_v31  ;;  %2286 = vmatpush.bf16.msra.mxu1 %v3467_v33 }
  0x2b   :  { %v3450_v37 = vld [vmem:[#allocation4 + $0x180] sm:$0xf]  ;;  %v4874_v39 = vld [vmem:[#allocation4 + $0x18c] sm:$0xf0]  ;;  %v3323_v44 = vor.u32 %v4842_v36, %v3322_v35  ;;  %2299 = vmatpush.bf16.msra.mxu2 %v3595_v34 }
  0x2c   :  { %v3578_v40 = vld [vmem:[#allocation4 + $0x280] sm:$0xf]  ;;  %v4906_v41 = vld [vmem:[#allocation4 + $0x28c] sm:$0xf0]  ;;  %v3451_v45 = vor.u32 %v4874_v39, %v3450_v37  ;;  %2312 = vmatpush.bf16.msra.mxu3 %v3723_v38 }
  0x2d   :  { %v3706_v42 = vld [vmem:[#allocation4 + $0x380] sm:$0xf]  ;;  %v4938_v43 = vld [vmem:[#allocation4 + $0x38c] sm:$0xf0]  ;;  %v3579_v46 = vor.u32 %v4906_v41, %v3578_v40  ;;  %2274 = vmatpush.bf16.msra.mxu0 %v3323_v44 }
  0x2e   :  { %v3306_v47 = vld [vmem:[#allocation4 + $0x60] sm:$0xf]  ;;  %v4838_v48 = vld [vmem:[#allocation4 + $0x6c] sm:$0xf0]  ;;  %v3707_v50 = vor.u32 %v4938_v43, %v3706_v42  ;;  %2287 = vmatpush.bf16.msra.mxu1 %v3451_v45 }
  0x2f   :  { %v3434_v49 = vld [vmem:[#allocation4 + $0x160] sm:$0xf]  ;;  %v4870_v51 = vld [vmem:[#allocation4 + $0x16c] sm:$0xf0]  ;;  %v3307_v56 = vor.u32 %v4838_v48, %v3306_v47  ;;  %2300 = vmatpush.bf16.msra.mxu2 %v3579_v46 }
  0x30   :  { %v3562_v52 = vld [vmem:[#allocation4 + $0x260] sm:$0xf]  ;;  %v4902_v53 = vld [vmem:[#allocation4 + $0x26c] sm:$0xf0]  ;;  %v3435_v57 = vor.u32 %v4870_v51, %v3434_v49  ;;  %2313 = vmatpush.bf16.msra.mxu3 %v3707_v50 }
  0x31   :  { %v3690_v54 = vld [vmem:[#allocation4 + $0x360] sm:$0xf]  ;;  %v4934_v55 = vld [vmem:[#allocation4 + $0x36c] sm:$0xf0]  ;;  %v3563_v58 = vor.u32 %v4902_v53, %v3562_v52  ;;  %2275 = vmatpush.bf16.msra.mxu0 %v3307_v56 }
  0x32   :  { %v3290_v59 = vld [vmem:[#allocation4 + $0x40] sm:$0xf]  ;;  %v4834_v60 = vld [vmem:[#allocation4 + $0x4c] sm:$0xf0]  ;;  %v3691_v62 = vor.u32 %v4934_v55, %v3690_v54  ;;  %2288 = vmatpush.bf16.msra.mxu1 %v3435_v57 }
  0x33   :  { %v3418_v61 = vld [vmem:[#allocation4 + $0x140] sm:$0xf]  ;;  %v4866_v63 = vld [vmem:[#allocation4 + $0x14c] sm:$0xf0]  ;;  %v3291_v4 = vor.u32 %v4834_v60, %v3290_v59  ;;  %2301 = vmatpush.bf16.msra.mxu2 %v3563_v58 }
  0x34   :  { %v3546_v0 = vld [vmem:[#allocation4 + $0x240] sm:$0xf]  ;;  %v4898_v1 = vld [vmem:[#allocation4 + $0x24c] sm:$0xf0]  ;;  %v3419_v5 = vor.u32 %v4866_v63, %v3418_v61  ;;  %2314 = vmatpush.bf16.msra.mxu3 %v3691_v62 }
  0x35   :  { %v3674_v2 = vld [vmem:[#allocation4 + $0x340] sm:$0xf]  ;;  %v4930_v3 = vld [vmem:[#allocation4 + $0x34c] sm:$0xf0]  ;;  %v3547_v6 = vor.u32 %v4898_v1, %v3546_v0  ;;  %2276 = vmatpush.bf16.msra.mxu0 %v3291_v4  ;;  %v127_v4 = vld [vmem:[#allocation2] sm:$0xff] }
  0x36   :  { %v3274_v7 = vld [vmem:[#allocation4 + $0x20] sm:$0xf]  ;;  %v4830_v8 = vld [vmem:[#allocation4 + $0x2c] sm:$0xf0]  ;;  %v3675_v10 = vor.u32 %v4930_v3, %v3674_v2  ;;  %2289 = vmatpush.bf16.msra.mxu1 %v3419_v5  ;;  %v129_v3 = vld [vmem:[#allocation2 + $0x10] sm:$0xff] }
  0x37   :  { %v3402_v9 = vld [vmem:[#allocation4 + $0x120] sm:$0xf]  ;;  %v4862_v11 = vld [vmem:[#allocation4 + $0x12c] sm:$0xf0]  ;;  %v3275_v16 = vor.u32 %v4830_v8, %v3274_v7  ;;  %2302 = vmatpush.bf16.msra.mxu2 %v3547_v6  ;;  %v5478_v8 = vpack.c.bf16 %v129_v3, %v129_v3 }
  0x38   :  { %v3530_v12 = vld [vmem:[#allocation4 + $0x220] sm:$0xf]  ;;  %v4894_v13 = vld [vmem:[#allocation4 + $0x22c] sm:$0xf0]  ;;  %v3403_v19 = vor.u32 %v4862_v11, %v3402_v9  ;;  %2315 = vmatpush.bf16.msra.mxu3 %v3675_v10  ;;  %v5480_v9 = vpack.c.bf16 %v127_v4, %v127_v4 }
  0x39   :  { %v3658_v14 = vld [vmem:[#allocation4 + $0x320] sm:$0xf]  ;;  %v4926_v15 = vld [vmem:[#allocation4 + $0x32c] sm:$0xf0]  ;;  %v3531_v20 = vor.u32 %v4894_v13, %v3530_v12  ;;  %2277 = vmatpush.bf16.msra.mxu0 %v3275_v16 }
  0x3a   :  { %v3258_v17 = vld [vmem:[#allocation4] sm:$0xf]  ;;  %v4826_v18 = vld [vmem:[#allocation4 + $0xc] sm:$0xf0]  ;;  %v3659_v24 = vor.u32 %v4926_v15, %v3658_v14  ;;  %2290 = vmatpush.bf16.msra.mxu1 %v3403_v19 }
  0x3b   :  { %v3386_v21 = vld [vmem:[#allocation4 + $0x100] sm:$0xf]  ;;  %v4858_v22 = vld [vmem:[#allocation4 + $0x10c] sm:$0xf0]  ;;  %v3259_v31 = vor.u32 %v4826_v18, %v3258_v17  ;;  %2303 = vmatpush.bf16.msra.mxu2 %v3531_v20 }
  0x3c   :  { %v3514_v23 = vld [vmem:[#allocation4 + $0x200] sm:$0xf]  ;;  %v4890_v25 = vld [vmem:[#allocation4 + $0x20c] sm:$0xf0]  ;;  %v3387_v35 = vor.u32 %v4858_v22, %v3386_v21  ;;  %2316 = vmatpush.bf16.msra.mxu3 %v3659_v24 }
  0x3d   :  { %v3642_v26 = vld [vmem:[#allocation4 + $0x300] sm:$0xf]  ;;  %v4922_v27 = vld [vmem:[#allocation4 + $0x30c] sm:$0xf0]  ;;  %v3515_v36 = vor.u32 %v4890_v25, %v3514_v23  ;;  %2278 = vmatpush.bf16.msra.mxu0 %v3259_v31 }
  0x3e   :  { %v3882_v28 = vld [vmem:[#allocation4 + $0x4e0] sm:$0xf]  ;;  %v4982_v29 = vld [vmem:[#allocation4 + $0x4ec] sm:$0xf0]  ;;  %v3643_v39 = vor.u32 %v4922_v27, %v3642_v26  ;;  %2291 = vmatpush.bf16.msra.mxu1 %v3387_v35 }
  0x3f   :  { %v4010_v30 = vld [vmem:[#allocation4 + $0x5e0] sm:$0xf]  ;;  %v5014_v32 = vld [vmem:[#allocation4 + $0x5ec] sm:$0xf0]  ;;  %v3883_v40 = vor.u32 %v4982_v29, %v3882_v28  ;;  %2304 = vmatpush.bf16.msra.mxu2 %v3515_v36 }
  0x40   :  { %v4138_v33 = vld [vmem:[#allocation4 + $0x6e0] sm:$0xf]  ;;  %v5046_v34 = vld [vmem:[#allocation4 + $0x6ec] sm:$0xf0]  ;;  %v4011_v41 = vor.u32 %v5014_v32, %v4010_v30  ;;  %2317 = vmatpush.bf16.msra.mxu3 %v3643_v39  ;;  %2279 = vmatmul.bf16.vlgmr.msra.gmra.mxu0 %v5480_v9 }
  0x41   :  { %v4266_v37 = vld [vmem:[#allocation4 + $0x7e0] sm:$0xf]  ;;  %v5078_v38 = vld [vmem:[#allocation4 + $0x7ec] sm:$0xf0]  ;;  %v4139_v42 = vor.u32 %v5046_v34, %v4138_v33  ;;  %2323 = vmatpush.bf16.msrb.mxu0 %v3883_v40 }
  0x42   :  { %v3866_v43 = vld [vmem:[#allocation4 + $0x4c0] sm:$0xf]  ;;  %v4978_v44 = vld [vmem:[#allocation4 + $0x4cc] sm:$0xf0]  ;;  %v4267_v46 = vor.u32 %v5078_v38, %v4266_v37  ;;  %2336 = vmatpush.bf16.msrb.mxu1 %v4011_v41  ;;  %2305 = vmatmul.bf16.vlgmr.msra.gmra.mxu2 %v5478_v8 }
  0x43   :  { %v3994_v45 = vld [vmem:[#allocation4 + $0x5c0] sm:$0xf]  ;;  %v5010_v47 = vld [vmem:[#allocation4 + $0x5cc] sm:$0xf0]  ;;  %v3867_v52 = vor.u32 %v4978_v44, %v3866_v43  ;;  %2349 = vmatpush.bf16.msrb.mxu2 %v4139_v42 }
  0x44   :  { %v4122_v48 = vld [vmem:[#allocation4 + $0x6c0] sm:$0xf]  ;;  %v5042_v49 = vld [vmem:[#allocation4 + $0x6cc] sm:$0xf0]  ;;  %v3995_v54 = vor.u32 %v5010_v47, %v3994_v45  ;;  %2362 = vmatpush.bf16.msrb.mxu3 %v4267_v46 }
  0x45   :  { %v4250_v50 = vld [vmem:[#allocation4 + $0x7c0] sm:$0xf]  ;;  %v5074_v51 = vld [vmem:[#allocation4 + $0x7cc] sm:$0xf0]  ;;  %v4123_v55 = vor.u32 %v5042_v49, %v4122_v48  ;;  %2324 = vmatpush.bf16.msrb.mxu0 %v3867_v52 }
  0x46   :  { %v3850_v53 = vld [vmem:[#allocation4 + $0x4a0] sm:$0xf]  ;;  %v4974_v56 = vld [vmem:[#allocation4 + $0x4ac] sm:$0xf0]  ;;  %v4251_v59 = vor.u32 %v5074_v51, %v4250_v50  ;;  %2337 = vmatpush.bf16.msrb.mxu1 %v3995_v54 }
  0x47   :  { %v3978_v57 = vld [vmem:[#allocation4 + $0x5a0] sm:$0xf]  ;;  %v5006_v58 = vld [vmem:[#allocation4 + $0x5ac] sm:$0xf0]  ;;  %v3851_v0 = vor.u32 %v4974_v56, %v3850_v53  ;;  %2350 = vmatpush.bf16.msrb.mxu2 %v4123_v55 }
  0x48   :  { %v4106_v60 = vld [vmem:[#allocation4 + $0x6a0] sm:$0xf]  ;;  %v5038_v61 = vld [vmem:[#allocation4 + $0x6ac] sm:$0xf0]  ;;  %v3979_v1 = vor.u32 %v5006_v58, %v3978_v57  ;;  %2363 = vmatpush.bf16.msrb.mxu3 %v4251_v59 }
  0x49   :  { %v4234_v62 = vld [vmem:[#allocation4 + $0x7a0] sm:$0xf]  ;;  %v5070_v63 = vld [vmem:[#allocation4 + $0x7ac] sm:$0xf0]  ;;  %v4107_v5 = vor.u32 %v5038_v61, %v4106_v60  ;;  %2325 = vmatpush.bf16.msrb.mxu0 %v3851_v0 }
  0x4a   :  { %v3834_v2 = vld [vmem:[#allocation4 + $0x480] sm:$0xf]  ;;  %v4970_v6 = vld [vmem:[#allocation4 + $0x48c] sm:$0xf0]  ;;  %v4235_v11 = vor.u32 %v5070_v63, %v4234_v62  ;;  %2338 = vmatpush.bf16.msrb.mxu1 %v3979_v1 }
  0x4b   :  { %v3962_v7 = vld [vmem:[#allocation4 + $0x580] sm:$0xf]  ;;  %v5002_v12 = vld [vmem:[#allocation4 + $0x58c] sm:$0xf0]  ;;  %v3835_v18 = vor.u32 %v4970_v6, %v3834_v2  ;;  %2351 = vmatpush.bf16.msrb.mxu2 %v4107_v5 }
  0x4c   :  { %v130_v10 = vld [vmem:[#allocation2 + $0x18] sm:$0xff]  ;;  %v5034_v14 = vld [vmem:[#allocation4 + $0x68c] sm:$0xf0]  ;;  %v3963_v20 = vor.u32 %v5002_v12, %v3962_v7  ;;  %2364 = vmatpush.bf16.msrb.mxu3 %v4235_v11 }
  0x4d   :  { %v4090_v13 = vld [vmem:[#allocation4 + $0x680] sm:$0xf]  ;;  %v5482_v15 = vpack.c.bf16 %v130_v10, %v130_v10  ;;  %v5066_v17 = vld [vmem:[#allocation4 + $0x78c] sm:$0xf0]  ;;  %2326 = vmatpush.bf16.msrb.mxu0 %v3835_v18  ;;  %v133_v18 = vld [vmem:[#allocation2 + $0x30] sm:$0xff] }
  0x4e   :  { %v4218_v16 = vld [vmem:[#allocation4 + $0x780] sm:$0xf]  ;;  %v128_v19 = vld [vmem:[#allocation2 + $0x8] sm:$0xff]  ;;  %v4091_v21 = vor.u32 %v5034_v14, %v4090_v13  ;;  %2339 = vmatpush.bf16.msrb.mxu1 %v3963_v20 }
  0x4f   :  { %2318 = vmatmul.bf16.vlgmr.msra.gmra.mxu3 %v5482_v15  ;;  %v3818_v22 = vld [vmem:[#allocation4 + $0x460] sm:$0xf]  ;;  %v4966_v23 = vld [vmem:[#allocation4 + $0x46c] sm:$0xf0]  ;;  %v5487_v25 = vpack.c.bf16 %v128_v19, %v128_v19  ;;  %v4219_v26 = vor.u32 %v5066_v17, %v4218_v16  ;;  %v4852_v16 = vld [vmem:[#allocation4 + $0xe4] sm:$0xf] }
  0x50   :  { %v3946_v24 = vld [vmem:[#allocation4 + $0x560] sm:$0xf]  ;;  %v4998_v27 = vld [vmem:[#allocation4 + $0x56c] sm:$0xf0]  ;;  %v3819_v32 = vor.u32 %v4966_v23, %v3818_v22  ;;  %2352 = vmatpush.bf16.msrb.mxu2 %v4091_v21  ;;  %v3372_v17 = vld [vmem:[#allocation4 + $0xf0] sm:$0xf0] }
  0x51   :  { %v4074_v28 = vld [vmem:[#allocation4 + $0x660] sm:$0xf]  ;;  %v5030_v29 = vld [vmem:[#allocation4 + $0x66c] sm:$0xf0]  ;;  %2292 = vmatmul.bf16.vlgmr.msra.gmra.mxu1 %v5487_v25  ;;  %v3947_v33 = vor.u32 %v4998_v27, %v3946_v24  ;;  %2365 = vmatpush.bf16.msrb.mxu3 %v4219_v26  ;;  %v131_v22 = vld [vmem:[#allocation2 + $0x20] sm:$0xff] }
  0x52   :  { %v4202_v30 = vld [vmem:[#allocation4 + $0x760] sm:$0xf]  ;;  %v5062_v31 = vld [vmem:[#allocation4 + $0x76c] sm:$0xf0]  ;;  %v4075_v34 = vor.u32 %v5030_v29, %v4074_v28  ;;  %2327 = vmatpush.bf16.msrb.mxu0 %v3819_v32 }
  0x53   :  { %v3802_v35 = vld [vmem:[#allocation4 + $0x440] sm:$0xf]  ;;  %v4962_v36 = vld [vmem:[#allocation4 + $0x44c] sm:$0xf0]  ;;  %v4203_v38 = vor.u32 %v5062_v31, %v4202_v30  ;;  %2340 = vmatpush.bf16.msrb.mxu1 %v3947_v33  ;;  %v3375_v30 = vor.u32 %v4852_v16, %v3372_v17 }
  0x54   :  { %v3930_v37 = vld [vmem:[#allocation4 + $0x540] sm:$0xf]  ;;  %v4994_v39 = vld [vmem:[#allocation4 + $0x54c] sm:$0xf0]  ;;  %v3803_v44 = vor.u32 %v4962_v36, %v3802_v35  ;;  %2353 = vmatpush.bf16.msrb.mxu2 %v4075_v34  ;;  %v5490_v34 = vpack.c.bf16 %v133_v18, %v133_v18  ;;  %v4848_v35 = vld [vmem:[#allocation4 + $0xc4] sm:$0xf] }
  0x55   :  { %v4058_v40 = vld [vmem:[#allocation4 + $0x640] sm:$0xf]  ;;  %v5026_v41 = vld [vmem:[#allocation4 + $0x64c] sm:$0xf0]  ;;  %v3931_v45 = vor.u32 %v4994_v39, %v3930_v37  ;;  %2366 = vmatpush.bf16.msrb.mxu3 %v4203_v38  ;;  %v3356_v36 = vld [vmem:[#allocation4 + $0xd0] sm:$0xf0]  ;;  %v5492_v37 = vpack.c.bf16 %v131_v22, %v131_v22 }
  0x56   :  { %v4186_v42 = vld [vmem:[#allocation4 + $0x740] sm:$0xf]  ;;  %v5058_v43 = vld [vmem:[#allocation4 + $0x74c] sm:$0xf0]  ;;  %v4059_v46 = vor.u32 %v5026_v41, %v4058_v40  ;;  %2328 = vmatpush.bf16.msrb.mxu0 %v3803_v44 }
  0x57   :  { %v3786_v47 = vld [vmem:[#allocation4 + $0x420] sm:$0xf]  ;;  %v4958_v48 = vld [vmem:[#allocation4 + $0x42c] sm:$0xf0]  ;;  %v4187_v50 = vor.u32 %v5058_v43, %v4186_v42  ;;  %2341 = vmatpush.bf16.msrb.mxu1 %v3931_v45 }
  0x58   :  { %v3914_v49 = vld [vmem:[#allocation4 + $0x520] sm:$0xf]  ;;  %v4990_v51 = vld [vmem:[#allocation4 + $0x52c] sm:$0xf0]  ;;  %v3787_v56 = vor.u32 %v4958_v48, %v3786_v47  ;;  %2354 = vmatpush.bf16.msrb.mxu2 %v4059_v46  ;;  %v3359_v46 = vor.u32 %v4848_v35, %v3356_v36 }
  0x59   :  { %v4042_v52 = vld [vmem:[#allocation4 + $0x620] sm:$0xf]  ;;  %v5022_v53 = vld [vmem:[#allocation4 + $0x62c] sm:$0xf0]  ;;  %v3915_v59 = vor.u32 %v4990_v51, %v3914_v49  ;;  %2367 = vmatpush.bf16.msrb.mxu3 %v4187_v50  ;;  %v4844_v50 = vld [vmem:[#allocation4 + $0xa4] sm:$0xf] }
  0x5a   :  { %v4170_v54 = vld [vmem:[#allocation4 + $0x720] sm:$0xf]  ;;  %v5054_v55 = vld [vmem:[#allocation4 + $0x72c] sm:$0xf0]  ;;  %v4043_v60 = vor.u32 %v5022_v53, %v4042_v52  ;;  %2329 = vmatpush.bf16.msrb.mxu0 %v3787_v56  ;;  %v3340_v51 = vld [vmem:[#allocation4 + $0xb0] sm:$0xf0] }
  0x5b   :  { %v3770_v57 = vld [vmem:[#allocation4 + $0x400] sm:$0xf]  ;;  %v4954_v58 = vld [vmem:[#allocation4 + $0x40c] sm:$0xf0]  ;;  %v4171_v0 = vor.u32 %v5054_v55, %v4170_v54  ;;  %2342 = vmatpush.bf16.msrb.mxu1 %v3915_v59 }
  0x5c   :  { %v3898_v61 = vld [vmem:[#allocation4 + $0x500] sm:$0xf]  ;;  %v4986_v62 = vld [vmem:[#allocation4 + $0x50c] sm:$0xf0]  ;;  %v3771_v7 = vor.u32 %v4954_v58, %v3770_v57  ;;  %2355 = vmatpush.bf16.msrb.mxu2 %v4043_v60  ;;  %v3343_v58 = vor.u32 %v4844_v50, %v3340_v51 }
  0x5d   :  { %v4026_v63 = vld [vmem:[#allocation4 + $0x600] sm:$0xf]  ;;  %v5018_v1 = vld [vmem:[#allocation4 + $0x60c] sm:$0xf0]  ;;  %v3899_v13 = vor.u32 %v4986_v62, %v3898_v61  ;;  %2368 = vmatpush.bf16.msrb.mxu3 %v4171_v0  ;;  %v4840_v62 = vld [vmem:[#allocation4 + $0x84] sm:$0xf] }
  0x5e   :  { %v4154_v2 = vld [vmem:[#allocation4 + $0x700] sm:$0xf]  ;;  %v5050_v3 = vld [vmem:[#allocation4 + $0x70c] sm:$0xf0]  ;;  %v4027_v14 = vor.u32 %v5018_v1, %v4026_v63  ;;  %2330 = vmatpush.bf16.msrb.mxu0 %v3771_v7  ;;  %v3324_v63 = vld [vmem:[#allocation4 + $0x90] sm:$0xf0] }
  0x5f   :  { %v4394_v4 = vld [vmem:[#allocation4 + $0x8e0] sm:$0xf]  ;;  %v5110_v5 = vld [vmem:[#allocation4 + $0x8ec] sm:$0xf0]  ;;  %v4155_v19 = vor.u32 %v5050_v3, %v4154_v2  ;;  %2343 = vmatpush.bf16.msrb.mxu1 %v3899_v13  ;;  %v3308_v13 = vld [vmem:[#allocation4 + $0x70] sm:$0xf0] }
  0x60   :  { %v4522_v6 = vld [vmem:[#allocation4 + $0x9e0] sm:$0xf]  ;;  %v5142_v10 = vld [vmem:[#allocation4 + $0x9ec] sm:$0xf0]  ;;  %v4395_v20 = vor.u32 %v5110_v5, %v4394_v4  ;;  %2356 = vmatpush.bf16.msrb.mxu2 %v4027_v14 }
  0x61   :  { %v4650_v11 = vld [vmem:[#allocation4 + $0xae0] sm:$0xf]  ;;  %v5174_v12 = vld [vmem:[#allocation4 + $0xaec] sm:$0xf0]  ;;  %v4523_v24 = vor.u32 %v5142_v10, %v4522_v6  ;;  %2369 = vmatpush.bf16.msrb.mxu3 %v4155_v19  ;;  %2331 = vmatmul.bf16.vlgmr.msrb.gmra.mxu0 %v5492_v37  ;;  %v3327_v6 = vor.u32 %v4840_v62, %v3324_v63  ;;  %v3756_v62 = vld [vmem:[#allocation4 + $0x3f0] sm:$0xf0] }
  0x62   :  { %v4378_v21 = vld [vmem:[#allocation4 + $0x8c0] sm:$0xf]  ;;  %v4651_v26 = vor.u32 %v5174_v12, %v4650_v11  ;;  %v5106_v27 = vld [vmem:[#allocation4 + $0x8cc] sm:$0xf0]  ;;  %2375 = vmatpush.bf16.msra.mxu0 %v4395_v20  ;;  %v4836_v12 = vld [vmem:[#allocation4 + $0x64] sm:$0xf] }
  0x63   :  { %v134_v23 = vld [vmem:[#allocation2 + $0x38] sm:$0xff]  ;;  %v132_v29 = vld [vmem:[#allocation2 + $0x28] sm:$0xff]  ;;  %v4379_v39 = vor.u32 %v5106_v27, %v4378_v21  ;;  %2388 = vmatpush.bf16.msra.mxu1 %v4523_v24  ;;  %2357 = vmatmul.bf16.vlgmr.msrb.gmra.mxu2 %v5490_v34  ;;  %v3311_v21 = vor.u32 %v4836_v12, %v3308_v13 }
  0x64   :  { %v4506_v28 = vld [vmem:[#allocation4 + $0x9c0] sm:$0xf]  ;;  %v5138_v31 = vld [vmem:[#allocation4 + $0x9cc] sm:$0xf0]  ;;  %v5494_v38 = vpack.c.bf16 %v134_v23, %v134_v23  ;;  %v5496_v40 = vpack.c.bf16 %v132_v29, %v132_v29  ;;  %2401 = vmatpush.bf16.msra.mxu2 %v4651_v26  ;;  %v4832_v26 = vld [vmem:[#allocation4 + $0x44] sm:$0xf] }
  0x65   :  { %v4634_v32 = vld [vmem:[#allocation4 + $0xac0] sm:$0xf]  ;;  %v5170_v33 = vld [vmem:[#allocation4 + $0xacc] sm:$0xf0]  ;;  %v4507_v41 = vor.u32 %v5138_v31, %v4506_v28  ;;  %2414 = vmatpush.bf16.msra.mxu3 %v3375_v30  ;;  %v3292_v27 = vld [vmem:[#allocation4 + $0x50] sm:$0xf0] }
  0x66   :  { %v4635_v42 = vor.u32 %v5170_v33, %v4634_v32  ;;  %v4362_v43 = vld [vmem:[#allocation4 + $0x8a0] sm:$0xf]  ;;  %v5102_v44 = vld [vmem:[#allocation4 + $0x8ac] sm:$0xf0]  ;;  %2370 = vmatmul.bf16.vlgmr.msrb.gmra.mxu3 %v5494_v38  ;;  %2376 = vmatpush.bf16.msra.mxu0 %v4379_v39  ;;  %v3295_v35 = vor.u32 %v4832_v26, %v3292_v27  ;;  %v4880_v12 = vld [vmem:[#allocation4 + $0x1c4] sm:$0xf] }
  0x67   :  { %v4490_v45 = vld [vmem:[#allocation4 + $0x9a0] sm:$0xf]  ;;  %v5134_v47 = vld [vmem:[#allocation4 + $0x9ac] sm:$0xf0]  ;;  %v4363_v52 = vor.u32 %v5102_v44, %v4362_v43  ;;  %2344 = vmatmul.bf16.vlgmr.msrb.gmra.mxu1 %v5496_v40  ;;  %v3276_v43 = vld [vmem:[#allocation4 + $0x30] sm:$0xf0] }
  0x68   :  { %v4618_v48 = vld [vmem:[#allocation4 + $0xaa0] sm:$0xf]  ;;  %v5166_v49 = vld [vmem:[#allocation4 + $0xaac] sm:$0xf0]  ;;  %2389 = vmatpush.bf16.msra.mxu1 %v4507_v41  ;;  %2402 = vmatpush.bf16.msra.mxu2 %v4635_v42  ;;  %v4491_v53 = vor.u32 %v5134_v47, %v4490_v45  ;;  %v4828_v42 = vld [vmem:[#allocation4 + $0x24] sm:$0xf] }
  0x69   :  { %v4619_v54 = vor.u32 %v5166_v49, %v4618_v48  ;;  %v4346_v55 = vld [vmem:[#allocation4 + $0x880] sm:$0xf]  ;;  %v5098_v56 = vld [vmem:[#allocation4 + $0x88c] sm:$0xf0]  ;;  %2415 = vmatpush.bf16.msra.mxu3 %v3359_v46  ;;  %v3484_v13 = vld [vmem:[#allocation4 + $0x1d0] sm:$0xf0] }
  0x6a   :  { %v4474_v57 = vld [vmem:[#allocation4 + $0x980] sm:$0xf]  ;;  %v5130_v59 = vld [vmem:[#allocation4 + $0x98c] sm:$0xf0]  ;;  %2377 = vmatpush.bf16.msra.mxu0 %v4363_v52  ;;  %v4347_v0 = vor.u32 %v5098_v56, %v4346_v55  ;;  %v3260_v55 = vld [vmem:[#allocation4 + $0x10] sm:$0xf0]  ;;  %v3487_v26 = vor.u32 %v4880_v12, %v3484_v13 }
  0x6b   :  { %v4602_v60 = vld [vmem:[#allocation4 + $0xa80] sm:$0xf]  ;;  %v5162_v61 = vld [vmem:[#allocation4 + $0xa8c] sm:$0xf0]  ;;  %v4475_v1 = vor.u32 %v5130_v59, %v4474_v57  ;;  %v4884_v56 = vld [vmem:[#allocation4 + $0x1e4] sm:$0xf] }
  0x6c   :  { %2390 = vmatpush.bf16.msra.mxu1 %v4491_v53  ;;  %2403 = vmatpush.bf16.msra.mxu2 %v4619_v54  ;;  %v4603_v2 = vor.u32 %v5162_v61, %v4602_v60  ;;  %v4330_v3 = vld [vmem:[#allocation4 + $0x860] sm:$0xf]  ;;  %v5094_v4 = vld [vmem:[#allocation4 + $0x86c] sm:$0xf0]  ;;  %v4824_v53 = vld [vmem:[#allocation4 + $0x4] sm:$0xf]  ;;  %v3279_v54 = vor.u32 %v4828_v42, %v3276_v43 }
  0x6d   :  { %v4458_v5 = vld [vmem:[#allocation4 + $0x960] sm:$0xf]  ;;  %2416 = vmatpush.bf16.msra.mxu3 %v3343_v58  ;;  %v5126_v7 = vld [vmem:[#allocation4 + $0x96c] sm:$0xf0]  ;;  %v4331_v14 = vor.u32 %v5094_v4, %v4330_v3  ;;  %v3500_v57 = vld [vmem:[#allocation4 + $0x1f0] sm:$0xf0]  ;;  %v3263_v4 = vor.u32 %v4824_v53, %v3260_v55 }
  0x6e   :  { %v4586_v10 = vld [vmem:[#allocation4 + $0xa60] sm:$0xf]  ;;  %v5158_v11 = vld [vmem:[#allocation4 + $0xa6c] sm:$0xf0]  ;;  %2378 = vmatpush.bf16.msra.mxu0 %v4347_v0  ;;  %v4459_v16 = vor.u32 %v5126_v7, %v4458_v5  ;;  %v4916_v58 = vld [vmem:[#allocation4 + $0x2e4] sm:$0xf]  ;;  %v3503_v5 = vor.u32 %v4884_v56, %v3500_v57 }
  0x6f   :  { %v4587_v17 = vor.u32 %v5158_v11, %v4586_v10  ;;  %v4314_v18 = vld [vmem:[#allocation4 + $0x840] sm:$0xf]  ;;  %v5090_v19 = vld [vmem:[#allocation4 + $0x84c] sm:$0xf0]  ;;  %v3628_v60 = vld [vmem:[#allocation4 + $0x2f0] sm:$0xf0] }
  0x70   :  { %2391 = vmatpush.bf16.msra.mxu1 %v4475_v1  ;;  %2404 = vmatpush.bf16.msra.mxu2 %v4603_v2  ;;  %v4442_v20 = vld [vmem:[#allocation4 + $0x940] sm:$0xf]  ;;  %v5122_v22 = vld [vmem:[#allocation4 + $0x94c] sm:$0xf0]  ;;  %v4315_v28 = vor.u32 %v5090_v19, %v4314_v18  ;;  %v4948_v61 = vld [vmem:[#allocation4 + $0x3e4] sm:$0xf]  ;;  %v3631_v10 = vor.u32 %v4916_v58, %v3628_v60 }
  0x71   :  { %2417 = vmatpush.bf16.msra.mxu3 %v3327_v6  ;;  %v4570_v23 = vld [vmem:[#allocation4 + $0xa40] sm:$0xf]  ;;  %v5154_v24 = vld [vmem:[#allocation4 + $0xa4c] sm:$0xf0]  ;;  %v4443_v29 = vor.u32 %v5122_v22, %v4442_v20  ;;  %v4980_v1 = vld [vmem:[#allocation4 + $0x4e4] sm:$0xf]  ;;  %v3759_v11 = vor.u32 %v4948_v61, %v3756_v62 }
  0x72   :  { %2379 = vmatpush.bf16.msra.mxu0 %v4331_v14  ;;  %v4571_v30 = vor.u32 %v5154_v24, %v4570_v23  ;;  %v4298_v31 = vld [vmem:[#allocation4 + $0x820] sm:$0xf]  ;;  %v5086_v32 = vld [vmem:[#allocation4 + $0x82c] sm:$0xf0]  ;;  %v3884_v2 = vld [vmem:[#allocation4 + $0x4f0] sm:$0xf0] }
  0x73   :  { %v4426_v33 = vld [vmem:[#allocation4 + $0x920] sm:$0xf]  ;;  %v5118_v36 = vld [vmem:[#allocation4 + $0x92c] sm:$0xf0]  ;;  %v4299_v45 = vor.u32 %v5086_v32, %v4298_v31  ;;  %v135_v3 = vld [vmem:[#allocation2 + $0x40] sm:$0xff] }
  0x74   :  { %2392 = vmatpush.bf16.msra.mxu1 %v4459_v16  ;;  %2405 = vmatpush.bf16.msra.mxu2 %v4587_v17  ;;  %v4554_v39 = vld [vmem:[#allocation4 + $0xa20] sm:$0xf]  ;;  %v5150_v41 = vld [vmem:[#allocation4 + $0xa2c] sm:$0xf0]  ;;  %v4427_v49 = vor.u32 %v5118_v36, %v4426_v33  ;;  %v137_v6 = vld [vmem:[#allocation2 + $0x50] sm:$0xff]  ;;  %v3887_v16 = vor.u32 %v4980_v1, %v3884_v2  ;;  %v5502_v17 = vpack.c.bf16 %v135_v3, %v135_v3 }
  0x75   :  { %2418 = vmatpush.bf16.msra.mxu3 %v3311_v21  ;;  %v4282_v44 = vld [vmem:[#allocation4 + $0x800] sm:$0xf]  ;;  %v5082_v46 = vld [vmem:[#allocation4 + $0x80c] sm:$0xf0]  ;;  %v4555_v50 = vor.u32 %v5150_v41, %v4554_v39  ;;  %v4912_v14 = vld [vmem:[#allocation4 + $0x2c4] sm:$0xf]  ;;  %v5504_v21 = vpack.c.bf16 %v137_v6, %v137_v6 }
  0x76   :  { %2380 = vmatpush.bf16.msra.mxu0 %v4315_v28  ;;  %v4410_v47 = vld [vmem:[#allocation4 + $0x900] sm:$0xf]  ;;  %v5114_v48 = vld [vmem:[#allocation4 + $0x90c] sm:$0xf0]  ;;  %v4283_v59 = vor.u32 %v5082_v46, %v4282_v44  ;;  %v3612_v18 = vld [vmem:[#allocation4 + $0x2d0] sm:$0xf0] }
  0x77   :  { %v4538_v51 = vld [vmem:[#allocation4 + $0xa00] sm:$0xf]  ;;  %v5146_v52 = vld [vmem:[#allocation4 + $0xa0c] sm:$0xf0]  ;;  %v4411_v63 = vor.u32 %v5114_v48, %v4410_v47  ;;  %v4944_v19 = vld [vmem:[#allocation4 + $0x3c4] sm:$0xf]  ;;  %v3615_v27 = vor.u32 %v4912_v14, %v3612_v18 }
  0x78   :  { %2393 = vmatpush.bf16.msra.mxu1 %v4443_v29  ;;  %2406 = vmatpush.bf16.msra.mxu2 %v4571_v30  ;;  %v4539_v0 = vor.u32 %v5146_v52, %v4538_v51  ;;  %v136_v7 = vld [vmem:[#allocation2 + $0x48] sm:$0xff]  ;;  %v4976_v23 = vld [vmem:[#allocation4 + $0x4c4] sm:$0xf] }
  0x79   :  { %2419 = vmatpush.bf16.msra.mxu3 %v3295_v35  ;;  %v3740_v20 = vld [vmem:[#allocation4 + $0x3d0] sm:$0xf0]  ;;  %v5506_v22 = vpack.c.bf16 %v136_v7, %v136_v7  ;;  %v4876_v29 = vld [vmem:[#allocation4 + $0x1a4] sm:$0xf] }
  0x7a   :  { %2381 = vmatpush.bf16.msra.mxu0 %v4299_v45  ;;  %v3868_v24 = vld [vmem:[#allocation4 + $0x4d0] sm:$0xf0]  ;;  %v3743_v28 = vor.u32 %v4944_v19, %v3740_v20  ;;  %v4908_v31 = vld [vmem:[#allocation4 + $0x2a4] sm:$0xf] }
  0x7b   :  { %v3468_v30 = vld [vmem:[#allocation4 + $0x1b0] sm:$0xf0]  ;;  %v3871_v32 = vor.u32 %v4976_v23, %v3868_v24  ;;  %v4940_v35 = vld [vmem:[#allocation4 + $0x3a4] sm:$0xf] }
  0x7c   :  { %2394 = vmatpush.bf16.msra.mxu1 %v4427_v49  ;;  %2407 = vmatpush.bf16.msra.mxu2 %v4555_v50  ;;  %v3596_v33 = vld [vmem:[#allocation4 + $0x2b0] sm:$0xf0]  ;;  %v4972_v39 = vld [vmem:[#allocation4 + $0x4a4] sm:$0xf]  ;;  %v3471_v42 = vor.u32 %v4876_v29, %v3468_v30 }
  0x7d   :  { %2420 = vmatpush.bf16.msra.mxu3 %v3279_v54  ;;  %v3724_v36 = vld [vmem:[#allocation4 + $0x3b0] sm:$0xf0]  ;;  %v3599_v43 = vor.u32 %v4908_v31, %v3596_v33  ;;  %v4872_v45 = vld [vmem:[#allocation4 + $0x184] sm:$0xf] }
  0x7e   :  { %2382 = vmatpush.bf16.msra.mxu0 %v4283_v59  ;;  %v3852_v41 = vld [vmem:[#allocation4 + $0x4b0] sm:$0xf0]  ;;  %v3727_v44 = vor.u32 %v4940_v35, %v3724_v36  ;;  %v4904_v47 = vld [vmem:[#allocation4 + $0x284] sm:$0xf] }
  0x7f   :  { %v3452_v46 = vld [vmem:[#allocation4 + $0x190] sm:$0xf0]  ;;  %v3855_v48 = vor.u32 %v4972_v39, %v3852_v41  ;;  %v4936_v50 = vld [vmem:[#allocation4 + $0x384] sm:$0xf] }
  0x80   :  { %2395 = vmatpush.bf16.msra.mxu1 %v4411_v63  ;;  %2408 = vmatpush.bf16.msra.mxu2 %v4539_v0  ;;  %v3580_v49 = vld [vmem:[#allocation4 + $0x290] sm:$0xf0]  ;;  %v4968_v52 = vld [vmem:[#allocation4 + $0x484] sm:$0xf]  ;;  %v3455_v54 = vor.u32 %v4872_v45, %v3452_v46 }
  0x81   :  { %2421 = vmatpush.bf16.msra.mxu3 %v3263_v4  ;;  %2383 = vmatmul.bf16.vlgmr.msra.gmra.mxu0 %v5502_v17  ;;  %v3708_v51 = vld [vmem:[#allocation4 + $0x390] sm:$0xf0]  ;;  %v3583_v55 = vor.u32 %v4904_v47, %v3580_v49  ;;  %v4868_v57 = vld [vmem:[#allocation4 + $0x164] sm:$0xf] }
  0x82   :  { %2427 = vmatpush.bf16.msrb.mxu0 %v3503_v5  ;;  %v3836_v53 = vld [vmem:[#allocation4 + $0x490] sm:$0xf0]  ;;  %v3711_v56 = vor.u32 %v4936_v50, %v3708_v51  ;;  %v4900_v59 = vld [vmem:[#allocation4 + $0x264] sm:$0xf] }
  0x83   :  { %2409 = vmatmul.bf16.vlgmr.msra.gmra.mxu2 %v5504_v21  ;;  %2396 = vmatmul.bf16.vlgmr.msra.gmra.mxu1 %v5506_v22  ;;  %v3436_v58 = vld [vmem:[#allocation4 + $0x170] sm:$0xf0]  ;;  %v3839_v60 = vor.u32 %v4968_v52, %v3836_v53  ;;  %v4932_v62 = vld [vmem:[#allocation4 + $0x364] sm:$0xf] }
  0x84   :  { %2440 = vmatpush.bf16.msrb.mxu1 %v3631_v10  ;;  %2453 = vmatpush.bf16.msrb.mxu2 %v3759_v11  ;;  %v3564_v61 = vld [vmem:[#allocation4 + $0x270] sm:$0xf0]  ;;  %v4964_v0 = vld [vmem:[#allocation4 + $0x464] sm:$0xf]  ;;  %v3439_v2 = vor.u32 %v4868_v57, %v3436_v58 }
  0x85   :  { %2466 = vmatpush.bf16.msrb.mxu3 %v3887_v16  ;;  %v3692_v63 = vld [vmem:[#allocation4 + $0x370] sm:$0xf0]  ;;  %v3567_v3 = vor.u32 %v4900_v59, %v3564_v61  ;;  %v4864_v5 = vld [vmem:[#allocation4 + $0x144] sm:$0xf] }
  0x86   :  { %2428 = vmatpush.bf16.msrb.mxu0 %v3487_v26  ;;  %2422 = vmatmul.bf16.vlgmr.msra.gmra.mxu3 %v5480_v9  ;;  %v3820_v1 = vld [vmem:[#allocation4 + $0x470] sm:$0xf0]  ;;  %v3695_v4 = vor.u32 %v4932_v62, %v3692_v63  ;;  %v4896_v7 = vld [vmem:[#allocation4 + $0x244] sm:$0xf] }
  0x87   :  { %v3420_v6 = vld [vmem:[#allocation4 + $0x150] sm:$0xf0]  ;;  %v3823_v10 = vor.u32 %v4964_v0, %v3820_v1  ;;  %v4928_v12 = vld [vmem:[#allocation4 + $0x344] sm:$0xf] }
  0x88   :  { %2441 = vmatpush.bf16.msrb.mxu1 %v3615_v27  ;;  %2454 = vmatpush.bf16.msrb.mxu2 %v3743_v28  ;;  %v3548_v11 = vld [vmem:[#allocation4 + $0x250] sm:$0xf0]  ;;  %v4960_v14 = vld [vmem:[#allocation4 + $0x444] sm:$0xf]  ;;  %v3423_v18 = vor.u32 %v4864_v5, %v3420_v6 }
  0x89   :  { %2467 = vmatpush.bf16.msrb.mxu3 %v3871_v32  ;;  %v3676_v13 = vld [vmem:[#allocation4 + $0x350] sm:$0xf0]  ;;  %v3551_v19 = vor.u32 %v4896_v7, %v3548_v11  ;;  %v4860_v23 = vld [vmem:[#allocation4 + $0x124] sm:$0xf] }
  0x8a   :  { %2429 = vmatpush.bf16.msrb.mxu0 %v3471_v42  ;;  %v3804_v16 = vld [vmem:[#allocation4 + $0x450] sm:$0xf0]  ;;  %v3679_v20 = vor.u32 %v4928_v12, %v3676_v13  ;;  %v4892_v26 = vld [vmem:[#allocation4 + $0x224] sm:$0xf] }
  0x8b   :  { %v3404_v24 = vld [vmem:[#allocation4 + $0x130] sm:$0xf0]  ;;  %v3807_v27 = vor.u32 %v4960_v14, %v3804_v16  ;;  %v4924_v29 = vld [vmem:[#allocation4 + $0x324] sm:$0xf] }
  0x8c   :  { %2442 = vmatpush.bf16.msrb.mxu1 %v3599_v43  ;;  %2455 = vmatpush.bf16.msrb.mxu2 %v3727_v44  ;;  %v3532_v28 = vld [vmem:[#allocation4 + $0x230] sm:$0xf0]  ;;  %v4956_v31 = vld [vmem:[#allocation4 + $0x424] sm:$0xf]  ;;  %v3407_v33 = vor.u32 %v4860_v23, %v3404_v24 }
  0x8d   :  { %2468 = vmatpush.bf16.msrb.mxu3 %v3855_v48  ;;  %v3660_v30 = vld [vmem:[#allocation4 + $0x330] sm:$0xf0]  ;;  %v4856_v35 = vld [vmem:[#allocation4 + $0x104] sm:$0xf]  ;;  %v3535_v39 = vor.u32 %v4892_v26, %v3532_v28 }
  0x8e   :  { %2430 = vmatpush.bf16.msrb.mxu0 %v3455_v54  ;;  %v3788_v32 = vld [vmem:[#allocation4 + $0x430] sm:$0xf0]  ;;  %v3663_v41 = vor.u32 %v4924_v29, %v3660_v30  ;;  %v4888_v42 = vld [vmem:[#allocation4 + $0x204] sm:$0xf] }
  0x8f   :  { %v3388_v36 = vld [vmem:[#allocation4 + $0x110] sm:$0xf0]  ;;  %v4920_v44 = vld [vmem:[#allocation4 + $0x304] sm:$0xf]  ;;  %v3791_v45 = vor.u32 %v4956_v31, %v3788_v32 }
  0x90   :  { %2443 = vmatpush.bf16.msrb.mxu1 %v3583_v55  ;;  %2456 = vmatpush.bf16.msrb.mxu2 %v3711_v56  ;;  %v3516_v43 = vld [vmem:[#allocation4 + $0x210] sm:$0xf0]  ;;  %v4952_v47 = vld [vmem:[#allocation4 + $0x404] sm:$0xf]  ;;  %v3391_v52 = vor.u32 %v4856_v35, %v3388_v36 }
  0x91   :  { %2469 = vmatpush.bf16.msrb.mxu3 %v3839_v60  ;;  %v3644_v46 = vld [vmem:[#allocation4 + $0x310] sm:$0xf0]  ;;  %v5012_v49 = vld [vmem:[#allocation4 + $0x5e4] sm:$0xf]  ;;  %v3519_v56 = vor.u32 %v4888_v42, %v3516_v43 }
  0x92   :  { %2431 = vmatpush.bf16.msrb.mxu0 %v3439_v2  ;;  %v3772_v48 = vld [vmem:[#allocation4 + $0x410] sm:$0xf0]  ;;  %v5044_v51 = vld [vmem:[#allocation4 + $0x6e4] sm:$0xf]  ;;  %v3647_v57 = vor.u32 %v4920_v44, %v3644_v46 }
  0x93   :  { %v4012_v50 = vld [vmem:[#allocation4 + $0x5f0] sm:$0xf0]  ;;  %v5076_v54 = vld [vmem:[#allocation4 + $0x7e4] sm:$0xf]  ;;  %v3775_v60 = vor.u32 %v4952_v47, %v3772_v48 }
  0x94   :  { %2444 = vmatpush.bf16.msrb.mxu1 %v3567_v3  ;;  %2457 = vmatpush.bf16.msrb.mxu2 %v3695_v4  ;;  %v4140_v53 = vld [vmem:[#allocation4 + $0x6f0] sm:$0xf0]  ;;  %v5108_v58 = vld [vmem:[#allocation4 + $0x8e4] sm:$0xf]  ;;  %v4015_v61 = vor.u32 %v5012_v49, %v4012_v50 }
  0x95   :  { %2470 = vmatpush.bf16.msrb.mxu3 %v3823_v10  ;;  %v4268_v55 = vld [vmem:[#allocation4 + $0x7f0] sm:$0xf0]  ;;  %v4143_v62 = vor.u32 %v5044_v51, %v4140_v53  ;;  %v5008_v0 = vld [vmem:[#allocation4 + $0x5c4] sm:$0xf] }
  0x96   :  { %2432 = vmatpush.bf16.msrb.mxu0 %v3423_v18  ;;  %v4396_v59 = vld [vmem:[#allocation4 + $0x8f0] sm:$0xf0]  ;;  %v4271_v63 = vor.u32 %v5076_v54, %v4268_v55  ;;  %v5040_v2 = vld [vmem:[#allocation4 + $0x6c4] sm:$0xf] }
  0x97   :  { %v3996_v1 = vld [vmem:[#allocation4 + $0x5d0] sm:$0xf0]  ;;  %v4399_v3 = vor.u32 %v5108_v58, %v4396_v59  ;;  %v5072_v5 = vld [vmem:[#allocation4 + $0x7c4] sm:$0xf] }
  0x98   :  { %2445 = vmatpush.bf16.msrb.mxu1 %v3551_v19  ;;  %2458 = vmatpush.bf16.msrb.mxu2 %v3679_v20  ;;  %v4124_v4 = vld [vmem:[#allocation4 + $0x6d0] sm:$0xf0]  ;;  %v5104_v7 = vld [vmem:[#allocation4 + $0x8c4] sm:$0xf]  ;;  %v3999_v11 = vor.u32 %v5008_v0, %v3996_v1 }
  0x99   :  { %2471 = vmatpush.bf16.msrb.mxu3 %v3807_v27  ;;  %v4252_v6 = vld [vmem:[#allocation4 + $0x7d0] sm:$0xf0]  ;;  %v4127_v12 = vor.u32 %v5040_v2, %v4124_v4  ;;  %v5004_v14 = vld [vmem:[#allocation4 + $0x5a4] sm:$0xf] }
  0x9a   :  { %2433 = vmatpush.bf16.msrb.mxu0 %v3407_v33  ;;  %v4380_v10 = vld [vmem:[#allocation4 + $0x8d0] sm:$0xf0]  ;;  %v4255_v13 = vor.u32 %v5072_v5, %v4252_v6  ;;  %v5036_v18 = vld [vmem:[#allocation4 + $0x6a4] sm:$0xf] }
  0x9b   :  { %v3980_v16 = vld [vmem:[#allocation4 + $0x5b0] sm:$0xf0]  ;;  %v4383_v19 = vor.u32 %v5104_v7, %v4380_v10  ;;  %v5068_v23 = vld [vmem:[#allocation4 + $0x7a4] sm:$0xf] }
  0x9c   :  { %2446 = vmatpush.bf16.msrb.mxu1 %v3535_v39  ;;  %2459 = vmatpush.bf16.msrb.mxu2 %v3663_v41  ;;  %v4108_v20 = vld [vmem:[#allocation4 + $0x6b0] sm:$0xf0]  ;;  %v5100_v26 = vld [vmem:[#allocation4 + $0x8a4] sm:$0xf]  ;;  %v3983_v28 = vor.u32 %v5004_v14, %v3980_v16 }
  0x9d   :  { %2472 = vmatpush.bf16.msrb.mxu3 %v3791_v45  ;;  %v4236_v24 = vld [vmem:[#allocation4 + $0x7b0] sm:$0xf0]  ;;  %v4111_v29 = vor.u32 %v5036_v18, %v4108_v20  ;;  %v5000_v31 = vld [vmem:[#allocation4 + $0x584] sm:$0xf] }
  0x9e   :  { %2434 = vmatpush.bf16.msrb.mxu0 %v3391_v52  ;;  %v4364_v27 = vld [vmem:[#allocation4 + $0x8b0] sm:$0xf0]  ;;  %v4239_v30 = vor.u32 %v5068_v23, %v4236_v24  ;;  %v5032_v33 = vld [vmem:[#allocation4 + $0x684] sm:$0xf] }
  0x9f   :  { %v3964_v32 = vld [vmem:[#allocation4 + $0x590] sm:$0xf0]  ;;  %v4367_v35 = vor.u32 %v5100_v26, %v4364_v27  ;;  %v5064_v39 = vld [vmem:[#allocation4 + $0x784] sm:$0xf] }
  0xa0   :  { %2447 = vmatpush.bf16.msrb.mxu1 %v3519_v56  ;;  %2460 = vmatpush.bf16.msrb.mxu2 %v3647_v57  ;;  %v4092_v36 = vld [vmem:[#allocation4 + $0x690] sm:$0xf0]  ;;  %v5096_v42 = vld [vmem:[#allocation4 + $0x884] sm:$0xf]  ;;  %v3967_v44 = vor.u32 %v5000_v31, %v3964_v32 }
  0xa1   :  { %2473 = vmatpush.bf16.msrb.mxu3 %v3775_v60  ;;  %2435 = vmatmul.bf16.vlgmr.msrb.gmra.mxu0 %v5487_v25  ;;  %v4220_v41 = vld [vmem:[#allocation4 + $0x790] sm:$0xf0]  ;;  %v4095_v45 = vor.u32 %v5032_v33, %v4092_v36  ;;  %v4996_v47 = vld [vmem:[#allocation4 + $0x564] sm:$0xf] }
  0xa2   :  { %2479 = vmatpush.bf16.msra.mxu0 %v4015_v61  ;;  %v4348_v43 = vld [vmem:[#allocation4 + $0x890] sm:$0xf0]  ;;  %v4223_v46 = vor.u32 %v5064_v39, %v4220_v41  ;;  %v5028_v49 = vld [vmem:[#allocation4 + $0x664] sm:$0xf] }
  0xa3   :  { %2461 = vmatmul.bf16.vlgmr.msrb.gmra.mxu2 %v5482_v15  ;;  %2448 = vmatmul.bf16.vlgmr.msrb.gmra.mxu1 %v5478_v8  ;;  %v3948_v48 = vld [vmem:[#allocation4 + $0x570] sm:$0xf0]  ;;  %v4351_v50 = vor.u32 %v5096_v42, %v4348_v43  ;;  %v5060_v52 = vld [vmem:[#allocation4 + $0x764] sm:$0xf] }
  0xa4   :  { %2492 = vmatpush.bf16.msra.mxu1 %v4143_v62  ;;  %2505 = vmatpush.bf16.msra.mxu2 %v4271_v63  ;;  %v4076_v51 = vld [vmem:[#allocation4 + $0x670] sm:$0xf0]  ;;  %v5092_v54 = vld [vmem:[#allocation4 + $0x864] sm:$0xf]  ;;  %v3951_v56 = vor.u32 %v4996_v47, %v3948_v48  ;;  %v3506_v48 = vld [vmem:[#allocation4 + $0x1e8] sm:$0xf] }
  0xa5   :  { %2518 = vmatpush.bf16.msra.mxu3 %v4399_v3  ;;  %v4204_v53 = vld [vmem:[#allocation4 + $0x770] sm:$0xf0]  ;;  %v4079_v57 = vor.u32 %v5028_v49, %v4076_v51  ;;  %v4992_v59 = vld [vmem:[#allocation4 + $0x544] sm:$0xf]  ;;  %v4887_v49 = vld [vmem:[#allocation4 + $0x1f4] sm:$0xf0] }
  0xa6   :  { %2474 = vmatmul.bf16.vlgmr.msrb.gmra.mxu3 %v5492_v37  ;;  %2480 = vmatpush.bf16.msra.mxu0 %v3999_v11  ;;  %v4332_v55 = vld [vmem:[#allocation4 + $0x870] sm:$0xf0]  ;;  %v4207_v58 = vor.u32 %v5060_v52, %v4204_v53  ;;  %v5024_v61 = vld [vmem:[#allocation4 + $0x644] sm:$0xf] }
  0xa7   :  { %v3932_v60 = vld [vmem:[#allocation4 + $0x550] sm:$0xf0]  ;;  %v4335_v62 = vor.u32 %v5092_v54, %v4332_v55  ;;  %v5056_v0 = vld [vmem:[#allocation4 + $0x744] sm:$0xf] }
  0xa8   :  { %2493 = vmatpush.bf16.msra.mxu1 %v4127_v12  ;;  %2506 = vmatpush.bf16.msra.mxu2 %v4255_v13  ;;  %v4060_v63 = vld [vmem:[#allocation4 + $0x650] sm:$0xf0]  ;;  %v5088_v2 = vld [vmem:[#allocation4 + $0x844] sm:$0xf]  ;;  %v3935_v4 = vor.u32 %v4992_v59, %v3932_v60  ;;  %v3362_v59 = vld [vmem:[#allocation4 + $0xc8] sm:$0xf] }
  0xa9   :  { %2519 = vmatpush.bf16.msra.mxu3 %v4383_v19  ;;  %v4188_v1 = vld [vmem:[#allocation4 + $0x750] sm:$0xf0]  ;;  %v4063_v5 = vor.u32 %v5024_v61, %v4060_v63  ;;  %v4988_v7 = vld [vmem:[#allocation4 + $0x524] sm:$0xf]  ;;  %v4851_v60 = vld [vmem:[#allocation4 + $0xd4] sm:$0xf0] }
  0xaa   :  { %2481 = vmatpush.bf16.msra.mxu0 %v3983_v28  ;;  %v4316_v3 = vld [vmem:[#allocation4 + $0x850] sm:$0xf0]  ;;  %v4191_v6 = vor.u32 %v5056_v0, %v4188_v1  ;;  %v5020_v11 = vld [vmem:[#allocation4 + $0x624] sm:$0xf]  ;;  %v3490_v61 = vld [vmem:[#allocation4 + $0x1c8] sm:$0xf]  ;;  %v3363_v1 = vor.u32 %v4851_v60, %v3362_v59 }
  0xab   :  { %v3916_v10 = vld [vmem:[#allocation4 + $0x530] sm:$0xf0]  ;;  %v4319_v12 = vor.u32 %v5088_v2, %v4316_v3  ;;  %v5052_v14 = vld [vmem:[#allocation4 + $0x724] sm:$0xf]  ;;  %v4835_v59 = vld [vmem:[#allocation4 + $0x54] sm:$0xf0] }
  0xac   :  { %2494 = vmatpush.bf16.msra.mxu1 %v4111_v29  ;;  %2507 = vmatpush.bf16.msra.mxu2 %v4239_v30  ;;  %v4044_v13 = vld [vmem:[#allocation4 + $0x630] sm:$0xf0]  ;;  %v5084_v18 = vld [vmem:[#allocation4 + $0x824] sm:$0xf]  ;;  %v3919_v20 = vor.u32 %v4988_v7, %v3916_v10  ;;  %v3346_v7 = vld [vmem:[#allocation4 + $0xa8] sm:$0xf] }
  0xad   :  { %2520 = vmatpush.bf16.msra.mxu3 %v4367_v35  ;;  %v4172_v16 = vld [vmem:[#allocation4 + $0x730] sm:$0xf0]  ;;  %v4984_v23 = vld [vmem:[#allocation4 + $0x504] sm:$0xf]  ;;  %v4047_v26 = vor.u32 %v5020_v11, %v4044_v13  ;;  %v4847_v10 = vld [vmem:[#allocation4 + $0xb4] sm:$0xf0] }
  0xae   :  { %2482 = vmatpush.bf16.msra.mxu0 %v3967_v44  ;;  %v4300_v19 = vld [vmem:[#allocation4 + $0x830] sm:$0xf0]  ;;  %v4175_v27 = vor.u32 %v5052_v14, %v4172_v16  ;;  %v5016_v28 = vld [vmem:[#allocation4 + $0x604] sm:$0xf]  ;;  %v3378_v44 = vld [vmem:[#allocation4 + $0xe8] sm:$0xf] }
  0xaf   :  { %v3900_v24 = vld [vmem:[#allocation4 + $0x510] sm:$0xf0]  ;;  %v5048_v30 = vld [vmem:[#allocation4 + $0x704] sm:$0xf]  ;;  %v4303_v31 = vor.u32 %v5084_v18, %v4300_v19  ;;  %v3474_v11 = vld [vmem:[#allocation4 + $0x1a8] sm:$0xf]  ;;  %v3347_v18 = vor.u32 %v4847_v10, %v3346_v7 }
  0xb0   :  { %2495 = vmatpush.bf16.msra.mxu1 %v4095_v45  ;;  %2508 = vmatpush.bf16.msra.mxu2 %v4223_v46  ;;  %v4028_v29 = vld [vmem:[#allocation4 + $0x610] sm:$0xf0]  ;;  %v5080_v33 = vld [vmem:[#allocation4 + $0x804] sm:$0xf]  ;;  %v3903_v42 = vor.u32 %v4984_v23, %v3900_v24  ;;  %v4855_v45 = vld [vmem:[#allocation4 + $0xf4] sm:$0xf0] }
  0xb1   :  { %2521 = vmatpush.bf16.msra.mxu3 %v4351_v50  ;;  %v4156_v32 = vld [vmem:[#allocation4 + $0x710] sm:$0xf0]  ;;  %v5140_v36 = vld [vmem:[#allocation4 + $0x9e4] sm:$0xf]  ;;  %v4031_v46 = vor.u32 %v5016_v28, %v4028_v29  ;;  %v3379_v53 = vor.u32 %v4855_v45, %v3378_v44  ;;  %v5520_v28 = vld [vmem:[#allocation6] sm:$0xf] }
  0xb2   :  { %2483 = vmatpush.bf16.msra.mxu0 %v3951_v56  ;;  %v4284_v35 = vld [vmem:[#allocation4 + $0x810] sm:$0xf0]  ;;  %v5172_v41 = vld [vmem:[#allocation4 + $0xae4] sm:$0xf]  ;;  %v4159_v47 = vor.u32 %v5048_v30, %v4156_v32  ;;  %v3458_v29 = vld [vmem:[#allocation4 + $0x188] sm:$0xf] }
  0xb3   :  { %v4524_v39 = vld [vmem:[#allocation4 + $0x9f0] sm:$0xf0]  ;;  %v4287_v50 = vor.u32 %v5080_v33, %v4284_v35  ;;  %v5136_v54 = vld [vmem:[#allocation4 + $0x9c4] sm:$0xf]  ;;  %v4875_v30 = vld [vmem:[#allocation4 + $0x194] sm:$0xf0] }
  0xb4   :  { %2496 = vmatpush.bf16.msra.mxu1 %v4079_v57  ;;  %2509 = vmatpush.bf16.msra.mxu2 %v4207_v58  ;;  %v4652_v43 = vld [vmem:[#allocation4 + $0xaf0] sm:$0xf0]  ;;  %v4527_v51 = vor.u32 %v5140_v36, %v4524_v39  ;;  %v5168_v56 = vld [vmem:[#allocation4 + $0xac4] sm:$0xf]  ;;  %v3507_v57 = vor.u32 %v4887_v49, %v3506_v48  ;;  %v3314_v44 = vld [vmem:[#allocation4 + $0x68] sm:$0xf] }
  0xb5   :  { %2522 = vmatpush.bf16.msra.mxu3 %v4335_v62  ;;  %v4655_v52 = vor.u32 %v5172_v41, %v4652_v43  ;;  %v4508_v55 = vld [vmem:[#allocation4 + $0x9d0] sm:$0xf0]  ;;  %v4883_v62 = vld [vmem:[#allocation4 + $0x1d4] sm:$0xf0]  ;;  %v5132_v2 = vld [vmem:[#allocation4 + $0x9a4] sm:$0xf] }
  0xb6   :  { %2484 = vmatpush.bf16.msra.mxu0 %v3935_v4  ;;  %v4636_v58 = vld [vmem:[#allocation4 + $0xad0] sm:$0xf0]  ;;  %v4511_v63 = vor.u32 %v5136_v54, %v4508_v55  ;;  %v5164_v4 = vld [vmem:[#allocation4 + $0xaa4] sm:$0xf]  ;;  %v503_v41 = vperm.slane %v5520_v28, 0 }
  0xb7   :  { %v4639_v0 = vor.u32 %v5168_v56, %v4636_v58  ;;  %v4492_v3 = vld [vmem:[#allocation4 + $0x9b0] sm:$0xf0]  ;;  %v5128_v14 = vld [vmem:[#allocation4 + $0x984] sm:$0xf]  ;;  %v4839_v45 = vld [vmem:[#allocation4 + $0x74] sm:$0xf0] }
  0xb8   :  { %2497 = vmatpush.bf16.msra.mxu1 %v4063_v5  ;;  %2510 = vmatpush.bf16.msra.mxu2 %v4191_v6  ;;  %v3491_v5 = vor.u32 %v4883_v62, %v3490_v61  ;;  %v4620_v6 = vld [vmem:[#allocation4 + $0xab0] sm:$0xf0]  ;;  %v4495_v13 = vor.u32 %v5132_v2, %v4492_v3  ;;  %v5124_v32 = vld [vmem:[#allocation4 + $0x964] sm:$0xf]  ;;  %v3298_v58 = vld [vmem:[#allocation4 + $0x48] sm:$0xf] }
  0xb9   :  { %2523 = vmatpush.bf16.msra.mxu3 %v4319_v12  ;;  %v4879_v12 = vld [vmem:[#allocation4 + $0x1b4] sm:$0xf0]  ;;  %v4623_v16 = vor.u32 %v5164_v4, %v4620_v6  ;;  %v4476_v19 = vld [vmem:[#allocation4 + $0x990] sm:$0xf0]  ;;  %v5156_v39 = vld [vmem:[#allocation4 + $0xa64] sm:$0xf] }
  0xba   :  { %2485 = vmatpush.bf16.msra.mxu0 %v3919_v20  ;;  %v5160_v20 = vld [vmem:[#allocation4 + $0xa84] sm:$0xf]  ;;  %v4604_v23 = vld [vmem:[#allocation4 + $0xa90] sm:$0xf0]  ;;  %v3475_v24 = vor.u32 %v4879_v12, %v3474_v11  ;;  %v3426_v60 = vld [vmem:[#allocation4 + $0x148] sm:$0xf] }
  0xbb   :  { %v4607_v33 = vor.u32 %v5160_v20, %v4604_v23  ;;  %v4460_v36 = vld [vmem:[#allocation4 + $0x970] sm:$0xf0]  ;;  %v5152_v54 = vld [vmem:[#allocation4 + $0xa44] sm:$0xf]  ;;  %v4867_v61 = vld [vmem:[#allocation4 + $0x154] sm:$0xf0] }
  0xbc   :  { %2498 = vmatpush.bf16.msra.mxu1 %v4047_v26  ;;  %2511 = vmatpush.bf16.msra.mxu2 %v4175_v27  ;;  %v3330_v26 = vld [vmem:[#allocation4 + $0x88] sm:$0xf]  ;;  %v4843_v27 = vld [vmem:[#allocation4 + $0x94] sm:$0xf0]  ;;  %v4588_v43 = vld [vmem:[#allocation4 + $0xa70] sm:$0xf0]  ;;  %v4463_v48 = vor.u32 %v5124_v32, %v4460_v36  ;;  %v3427_v6 = vor.u32 %v4867_v61, %v3426_v60 }
  0xbd   :  { %2524 = vmatpush.bf16.msra.mxu3 %v4303_v31  ;;  %v4479_v31 = vor.u32 %v5128_v14, %v4476_v19  ;;  %v3331_v35 = vor.u32 %v4843_v27, %v3330_v26  ;;  %v2280_v49 = vpop.f32.mrf.mxu0  ;;  %v5116_v2 = vld [vmem:[#allocation4 + $0x924] sm:$0xf]  ;;  %v4428_v3 = vld [vmem:[#allocation4 + $0x930] sm:$0xf0]  ;;  %v3282_v10 = vld [vmem:[#allocation4 + $0x28] sm:$0xf] }
  0xbe   :  { %2486 = vmatpush.bf16.msra.mxu0 %v3903_v42  ;;  %v3459_v42 = vor.u32 %v4875_v30, %v3458_v29  ;;  %v2281_v55 = vadd.f32 %v2280_v49, %v503_v41  ;;  %v5148_v4 = vld [vmem:[#allocation4 + $0xa24] sm:$0xf]  ;;  %v4556_v7 = vld [vmem:[#allocation4 + $0xa30] sm:$0xf0]  ;;  %v4831_v11 = vld [vmem:[#allocation4 + $0x34] sm:$0xf0]  ;;  %v4431_v19 = vor.u32 %v5116_v2, %v4428_v3 }
  0xbf   :  { %v4863_v14 = vld [vmem:[#allocation4 + $0x134] sm:$0xf0]  ;;  %v5112_v20 = vld [vmem:[#allocation4 + $0x904] sm:$0xf]  ;;  %v4412_v23 = vld [vmem:[#allocation4 + $0x910] sm:$0xf0]  ;;  %v4559_v26 = vor.u32 %v5148_v4, %v4556_v7  ;;  %v3283_v27 = vor.u32 %v4831_v11, %v3282_v10 }
  0xc0   :  { %2499 = vmatpush.bf16.msra.mxu1 %v4031_v46  ;;  %2512 = vmatpush.bf16.msra.mxu2 %v4159_v47  ;;  %v3442_v46 = vld [vmem:[#allocation4 + $0x168] sm:$0xf]  ;;  %v4871_v47 = vld [vmem:[#allocation4 + $0x174] sm:$0xf0]  ;;  %v5144_v29 = vld [vmem:[#allocation4 + $0xa04] sm:$0xf] }
  0xc1   :  { %2525 = vmatpush.bf16.msra.mxu3 %v4287_v50  ;;  %2487 = vmatmul.bf16.vlgmr.msra.gmra.mxu0 %v5496_v40  ;;  %v4591_v50 = vor.u32 %v5156_v39, %v4588_v43  ;;  %v3443_v56 = vor.u32 %v4871_v47, %v3442_v46  ;;  %v4540_v30 = vld [vmem:[#allocation4 + $0xa10] sm:$0xf0]  ;;  %v3394_v36 = vld [vmem:[#allocation4 + $0x108] sm:$0xf]  ;;  %v4859_v39 = vld [vmem:[#allocation4 + $0x114] sm:$0xf0] }
  0xc2   :  { %2531 = vmatpush.bf16.msrb.mxu0 %v4527_v51  ;;  %v3315_v51 = vor.u32 %v4839_v45, %v3314_v44  ;;  %v3634_v41 = vld [vmem:[#allocation4 + $0x2e8] sm:$0xf]  ;;  %v4415_v44 = vor.u32 %v5112_v20, %v4412_v23  ;;  %v4951_v45 = vld [vmem:[#allocation4 + $0x3f4] sm:$0xf0]  ;;  %v4543_v49 = vor.u32 %v5144_v29, %v4540_v30 }
  0xc3   :  { %2513 = vmatmul.bf16.vlgmr.msra.gmra.mxu2 %v5494_v38  ;;  %2500 = vmatmul.bf16.vlgmr.msra.gmra.mxu1 %v5490_v34  ;;  %v3762_v43 = vld [vmem:[#allocation4 + $0x3e8] sm:$0xf]  ;;  %v4983_v47 = vld [vmem:[#allocation4 + $0x4f4] sm:$0xf0] }
  0xc4   :  { %2544 = vmatpush.bf16.msrb.mxu1 %v4655_v52  ;;  %2557 = vmatpush.bf16.msrb.mxu2 %v3379_v53  ;;  %v5120_v52 = vld [vmem:[#allocation4 + $0x944] sm:$0xf]  ;;  %v4444_v53 = vld [vmem:[#allocation4 + $0x950] sm:$0xf0]  ;;  %v3890_v46 = vld [vmem:[#allocation4 + $0x4e8] sm:$0xf] }
  0xc5   :  { %2570 = vmatpush.bf16.msrb.mxu3 %v3507_v57  ;;  %v4572_v57 = vld [vmem:[#allocation4 + $0xa50] sm:$0xf0]  ;;  %v4447_v62 = vor.u32 %v5120_v52, %v4444_v53  ;;  %v2306_v12 = vpop.f32.mrf.mxu2  ;;  %v5015_v52 = vld [vmem:[#allocation4 + $0x5f4] sm:$0xf0]  ;;  %v3395_v53 = vor.u32 %v4859_v39, %v3394_v36  ;;  %v3746_v60 = vld [vmem:[#allocation4 + $0x3c8] sm:$0xf] }
  0xc6   :  { %2526 = vmatmul.bf16.vlgmr.msra.gmra.mxu3 %v5502_v17  ;;  %2532 = vmatpush.bf16.msrb.mxu0 %v4511_v63  ;;  %v4002_v2 = vld [vmem:[#allocation4 + $0x5c8] sm:$0xf]  ;;  %v5011_v3 = vld [vmem:[#allocation4 + $0x5d4] sm:$0xf0] }
  0xc7   :  { %v3602_v7 = vld [vmem:[#allocation4 + $0x2a8] sm:$0xf]  ;;  %v4911_v10 = vld [vmem:[#allocation4 + $0x2b4] sm:$0xf0] }
  0xc8   :  { %2545 = vmatpush.bf16.msrb.mxu1 %v4639_v0  ;;  %2558 = vmatpush.bf16.msrb.mxu2 %v3363_v1  ;;  %v4575_v0 = vor.u32 %v5152_v54, %v4572_v57  ;;  %v3299_v1 = vor.u32 %v4835_v59, %v3298_v58  ;;  %v3891_v57 = vor.u32 %v4983_v47, %v3890_v46  ;;  %v3618_v58 = vld [vmem:[#allocation4 + $0x2c8] sm:$0xf]  ;;  %v4915_v59 = vld [vmem:[#allocation4 + $0x2d4] sm:$0xf0] }
  0xc9   :  { %2571 = vmatpush.bf16.msrb.mxu3 %v3491_v5  ;;  %v3619_v4 = vor.u32 %v4915_v59, %v3618_v58  ;;  %v3730_v11 = vld [vmem:[#allocation4 + $0x3a8] sm:$0xf]  ;;  %v3603_v20 = vor.u32 %v4911_v10, %v3602_v7  ;;  %v5003_v39 = vld [vmem:[#allocation4 + $0x594] sm:$0xf0] }
  0xca   :  { %2533 = vmatpush.bf16.msrb.mxu0 %v4495_v13  ;;  %v3410_v13 = vld [vmem:[#allocation4 + $0x128] sm:$0xf]  ;;  %v4903_v46 = vld [vmem:[#allocation4 + $0x274] sm:$0xf0] }
  0xcb   :  { %v3714_v29 = vld [vmem:[#allocation4 + $0x388] sm:$0xf] }
  0xcc   :  { %2546 = vmatpush.bf16.msrb.mxu1 %v4623_v16  ;;  %2559 = vmatpush.bf16.msrb.mxu2 %v3347_v18  ;;  %v3970_v36 = vld [vmem:[#allocation4 + $0x588] sm:$0xf] }
  0xcd   :  { %2572 = vmatpush.bf16.msrb.mxu3 %v3475_v24  ;;  %v2282_v24 = vpop.f32.mrf.mxu0  ;;  %v3698_v47 = vld [vmem:[#allocation4 + $0x368] sm:$0xf] }
  0xce   :  { %2534 = vmatpush.bf16.msrb.mxu0 %v4479_v31  ;;  %v2293_v63 = vpop.f32.mrf.mxu1  ;;  %v3266_v31 = vld [vmem:[#allocation4 + $0x8] sm:$0xf] }
  0xcf   :  { %v2294_v5 = vadd.f32 %v2293_v63, %v2281_v55  ;;  %v2308_v55 = vpop.f32.mrf.mxu2  ;;  %v4947_v63 = vld [vmem:[#allocation4 + $0x3d4] sm:$0xf0] }
  0xd0   :  { %2547 = vmatpush.bf16.msrb.mxu1 %v4607_v33  ;;  %2560 = vmatpush.bf16.msrb.mxu2 %v3331_v35  ;;  %v3411_v33 = vor.u32 %v4863_v14, %v3410_v13  ;;  %v4827_v35 = vld [vmem:[#allocation4 + $0x14] sm:$0xf0]  ;;  %v3858_v14 = vld [vmem:[#allocation4 + $0x4a8] sm:$0xf] }
  0xd1   :  { %2573 = vmatpush.bf16.msrb.mxu3 %v3459_v42  ;;  %v2307_v16 = vadd.f32 %v2306_v12, %v2294_v5  ;;  %v4919_v42 = vld [vmem:[#allocation4 + $0x2f4] sm:$0xf0]  ;;  %v3747_v5 = vor.u32 %v4947_v63, %v3746_v60  ;;  %v4003_v12 = vor.u32 %v5011_v3, %v4002_v2  ;;  %v3554_v60 = vld [vmem:[#allocation4 + $0x248] sm:$0xf] }
  0xd2   :  { %2535 = vmatpush.bf16.msrb.mxu0 %v4463_v48  ;;  %v2319_v18 = vpop.f32.mrf.mxu3  ;;  %v3635_v54 = vor.u32 %v4919_v42, %v3634_v41  ;;  %v4943_v13 = vld [vmem:[#allocation4 + $0x3b4] sm:$0xf0] }
  0xd3   :  { %v5523_v32 = vadd.f32 %v2319_v18, %v2307_v16  ;;  %v4975_v16 = vld [vmem:[#allocation4 + $0x4b4] sm:$0xf0]  ;;  %v3986_v18 = vld [vmem:[#allocation4 + $0x5a8] sm:$0xf]  ;;  %v3731_v23 = vor.u32 %v4943_v13, %v3730_v11 }
  0xd4   :  { %2548 = vmatpush.bf16.msrb.mxu1 %v4591_v50  ;;  %2561 = vmatpush.bf16.msrb.mxu2 %v3315_v51  ;;  %v3267_v50 = vor.u32 %v4827_v35, %v3266_v31  ;;  %v4018_v51 = vld [vmem:[#allocation4 + $0x5e8] sm:$0xf]  ;;  %v3859_v24 = vor.u32 %v4975_v16, %v3858_v14  ;;  %v4939_v31 = vld [vmem:[#allocation4 + $0x394] sm:$0xf0] }
  0xd5   :  { %2574 = vmatpush.bf16.msrb.mxu3 %v3443_v56  ;;  %v3763_v56 = vor.u32 %v4951_v45, %v3762_v43  ;;  %v4971_v35 = vld [vmem:[#allocation4 + $0x494] sm:$0xf0]  ;;  %v3715_v43 = vor.u32 %v4939_v31, %v3714_v29  ;;  %v3570_v45 = vld [vmem:[#allocation4 + $0x268] sm:$0xf] }
  0xd6   :  { %2536 = vmatpush.bf16.msrb.mxu0 %v4447_v62  ;;  %v2295_v48 = vpop.f32.mrf.mxu1  ;;  %v4019_v62 = vor.u32 %v5015_v52, %v4018_v51  ;;  %v4935_v51 = vld [vmem:[#allocation4 + $0x374] sm:$0xf0]  ;;  %v3826_v52 = vld [vmem:[#allocation4 + $0x468] sm:$0xf] }
  0xd7   :  { %v4999_v55 = vld [vmem:[#allocation4 + $0x574] sm:$0xf0]  ;;  %v3699_v58 = vor.u32 %v4935_v51, %v3698_v47  ;;  %v3538_v14 = vld [vmem:[#allocation4 + $0x228] sm:$0xf] }
  0xd8   :  { %2549 = vmatpush.bf16.msrb.mxu1 %v4575_v0  ;;  %2562 = vmatpush.bf16.msrb.mxu2 %v3299_v1  ;;  %v3874_v0 = vld [vmem:[#allocation4 + $0x4c8] sm:$0xf]  ;;  %v4979_v1 = vld [vmem:[#allocation4 + $0x4d4] sm:$0xf0] }
  0xd9   :  { %2575 = vmatpush.bf16.msrb.mxu3 %v3427_v6  ;;  %v3875_v6 = vor.u32 %v4979_v1, %v3874_v0  ;;  %v4931_v0 = vld [vmem:[#allocation4 + $0x354] sm:$0xf0]  ;;  %v3810_v1 = vld [vmem:[#allocation4 + $0x448] sm:$0xf] }
  0xda   :  { %2537 = vmatpush.bf16.msrb.mxu0 %v4431_v19  ;;  %v2321_v61 = vpop.f32.mrf.mxu3  ;;  %v5007_v19 = vld [vmem:[#allocation4 + $0x5b4] sm:$0xf0]  ;;  %v3522_v31 = vld [vmem:[#allocation4 + $0x208] sm:$0xf] }
  0xdb   :  { %v3987_v30 = vor.u32 %v5007_v19, %v3986_v18  ;;  %v4899_v61 = vld [vmem:[#allocation4 + $0x254] sm:$0xf0]  ;;  %v3666_v18 = vld [vmem:[#allocation4 + $0x328] sm:$0xf] }
  0xdc   :  { %2550 = vmatpush.bf16.msrb.mxu1 %v4559_v26  ;;  %2563 = vmatpush.bf16.msrb.mxu2 %v3283_v27  ;;  %v3586_v26 = vld [vmem:[#allocation4 + $0x288] sm:$0xf]  ;;  %v4907_v27 = vld [vmem:[#allocation4 + $0x294] sm:$0xf0]  ;;  %v3555_v7 = vor.u32 %v4899_v61, %v3554_v60 }
  0xdd   :  { %2576 = vmatpush.bf16.msrb.mxu3 %v3411_v33  ;;  %v3842_v33 = vld [vmem:[#allocation4 + $0x488] sm:$0xf]  ;;  %v3587_v41 = vor.u32 %v4907_v27, %v3586_v26  ;;  %v4963_v2 = vld [vmem:[#allocation4 + $0x454] sm:$0xf0] }
  0xde   :  { %2538 = vmatpush.bf16.msrb.mxu0 %v4415_v44  ;;  %v2332_v42 = vpop.f32.mrf.mxu0  ;;  %v3843_v44 = vor.u32 %v4971_v35, %v3842_v33  ;;  %v3811_v13 = vor.u32 %v4963_v2, %v3810_v1  ;;  %v4895_v16 = vld [vmem:[#allocation4 + $0x234] sm:$0xf0]  ;;  %v3922_v27 = vld [vmem:[#allocation4 + $0x528] sm:$0xf] }
  0xdf   :  { %v2333_v48 = vadd.f32 %v2332_v42, %v5523_v32  ;;  %v4959_v26 = vld [vmem:[#allocation4 + $0x434] sm:$0xf0]  ;;  %v3778_v42 = vld [vmem:[#allocation4 + $0x408] sm:$0xf] }
  0xe0   :  { %2551 = vmatpush.bf16.msrb.mxu1 %v4543_v49  ;;  %2564 = vmatpush.bf16.msrb.mxu2 %v3267_v50  ;;  %v3971_v50 = vor.u32 %v5003_v39, %v3970_v36  ;;  %v4991_v29 = vld [vmem:[#allocation4 + $0x534] sm:$0xf0]  ;;  %v3650_v39 = vld [vmem:[#allocation4 + $0x308] sm:$0xf] }
  0xe1   :  { %2577 = vmatpush.bf16.msrb.mxu3 %v3395_v53  ;;  %2539 = vmatmul.bf16.vlgmr.msrb.gmra.mxu0 %v5506_v22  ;;  %v4967_v53 = vld [vmem:[#allocation4 + $0x474] sm:$0xf0]  ;;  %v4274_v51 = vld [vmem:[#allocation4 + $0x7e8] sm:$0xf] }
  0xe2   :  { %2583 = vmatpush.bf16.msra.mxu0 %v3635_v54  ;;  %v3954_v54 = vld [vmem:[#allocation4 + $0x568] sm:$0xf]  ;;  %v3827_v59 = vor.u32 %v4967_v53, %v3826_v52  ;;  %v4891_v33 = vld [vmem:[#allocation4 + $0x214] sm:$0xf0] }
  0xe3   :  { %2552 = vmatmul.bf16.vlgmr.msrb.gmra.mxu1 %v5504_v21  ;;  %2565 = vmatmul.bf16.vlgmr.msrb.gmra.mxu2 %v5480_v9  ;;  %v3955_v32 = vor.u32 %v4999_v55, %v3954_v54  ;;  %v4987_v47 = vld [vmem:[#allocation4 + $0x514] sm:$0xf0]  ;;  %v3523_v52 = vor.u32 %v4891_v33, %v3522_v31  ;;  %v4402_v54 = vld [vmem:[#allocation4 + $0x8e8] sm:$0xf] }
  0xe4   :  { %2596 = vmatpush.bf16.msra.mxu1 %v3763_v56  ;;  %2609 = vmatpush.bf16.msra.mxu2 %v3891_v57  ;;  %v2345_v49 = vpop.f32.mrf.mxu1  ;;  %v3571_v57 = vor.u32 %v4903_v46, %v3570_v45  ;;  %v4955_v45 = vld [vmem:[#allocation4 + $0x414] sm:$0xf0]  ;;  %v3906_v46 = vld [vmem:[#allocation4 + $0x508] sm:$0xf] }
  0xe5   :  { %2622 = vmatpush.bf16.msra.mxu3 %v4019_v62  ;;  %v2346_v56 = vadd.f32 %v2345_v49, %v2333_v48  ;;  %v3682_v62 = vld [vmem:[#allocation4 + $0x348] sm:$0xf]  ;;  %v5079_v53 = vld [vmem:[#allocation4 + $0x7f4] sm:$0xf0]  ;;  %v3907_v60 = vor.u32 %v4987_v47, %v3906_v46 }
  0xe6   :  { %2584 = vmatpush.bf16.msra.mxu0 %v3619_v4  ;;  %2578 = vmatmul.bf16.vlgmr.msrb.gmra.mxu3 %v5487_v25  ;;  %v2358_v63 = vpop.f32.mrf.mxu2  ;;  %v2334_v11 = vpop.f32.mrf.mxu0  ;;  %v4146_v49 = vld [vmem:[#allocation4 + $0x6e8] sm:$0xf]  ;;  %v5111_v55 = vld [vmem:[#allocation4 + $0x8f4] sm:$0xf0] }
  0xe7   :  { %v2359_v3 = vadd.f32 %v2358_v63, %v2346_v56  ;;  %v4403_v63 = vor.u32 %v5111_v55, %v4402_v54  ;;  %v4258_v1 = vld [vmem:[#allocation4 + $0x7c8] sm:$0xf]  ;;  %v5131_v46 = vld [vmem:[#allocation4 + $0x994] sm:$0xf0] }
  0xe8   :  { %2597 = vmatpush.bf16.msra.mxu1 %v3747_v5  ;;  %2610 = vmatpush.bf16.msra.mxu2 %v3875_v6  ;;  %v3938_v5 = vld [vmem:[#allocation4 + $0x548] sm:$0xf]  ;;  %v4995_v6 = vld [vmem:[#allocation4 + $0x554] sm:$0xf0] }
  0xe9   :  { %2623 = vmatpush.bf16.msra.mxu3 %v4003_v12  ;;  %v2371_v4 = vpop.f32.mrf.mxu3  ;;  %v3683_v12 = vor.u32 %v4931_v0, %v3682_v62  ;;  %v4275_v62 = vor.u32 %v5079_v53, %v4274_v51  ;;  %v5043_v0 = vld [vmem:[#allocation4 + $0x6d4] sm:$0xf0]  ;;  %v4098_v33 = vld [vmem:[#allocation4 + $0x688] sm:$0xf] }
  0xea   :  { %2585 = vmatpush.bf16.msra.mxu0 %v3603_v20  ;;  %v5530_v10 = vadd.f32 %v2371_v4, %v2359_v3  ;;  %v3939_v20 = vor.u32 %v4995_v6, %v3938_v5  ;;  %v5075_v3 = vld [vmem:[#allocation4 + $0x7d4] sm:$0xf0]  ;;  %v4386_v4 = vld [vmem:[#allocation4 + $0x8c8] sm:$0xf] }
  0xeb   :  { %v5107_v5 = vld [vmem:[#allocation4 + $0x8d4] sm:$0xf0]  ;;  %v4514_v6 = vld [vmem:[#allocation4 + $0x9c8] sm:$0xf] }
  0xec   :  { %2598 = vmatpush.bf16.msra.mxu1 %v3731_v23  ;;  %2611 = vmatpush.bf16.msra.mxu2 %v3859_v24  ;;  %v2347_v19 = vpop.f32.mrf.mxu1  ;;  %v4927_v23 = vld [vmem:[#allocation4 + $0x334] sm:$0xf0]  ;;  %v3794_v24 = vld [vmem:[#allocation4 + $0x428] sm:$0xf] }
  0xed   :  { %2624 = vmatpush.bf16.msra.mxu3 %v3987_v30  ;;  %v3539_v30 = vor.u32 %v4895_v16, %v3538_v14  ;;  %v3667_v35 = vor.u32 %v4927_v23, %v3666_v18  ;;  %v3795_v36 = vor.u32 %v4959_v26, %v3794_v24  ;;  %v4114_v14 = vld [vmem:[#allocation4 + $0x6a8] sm:$0xf]  ;;  %v5039_v16 = vld [vmem:[#allocation4 + $0x6b4] sm:$0xf0] }
  0xee   :  { %2586 = vmatpush.bf16.msra.mxu0 %v3587_v41  ;;  %v4923_v41 = vld [vmem:[#allocation4 + $0x314] sm:$0xf0]  ;;  %v4242_v18 = vld [vmem:[#allocation4 + $0x7a8] sm:$0xf] }
  0xef   :  { %v3651_v56 = vor.u32 %v4923_v41, %v3650_v39  ;;  %v4370_v23 = vld [vmem:[#allocation4 + $0x8a8] sm:$0xf]  ;;  %v5103_v24 = vld [vmem:[#allocation4 + $0x8b4] sm:$0xf0] }
  0xf0   :  { %2599 = vmatpush.bf16.msra.mxu1 %v3715_v43  ;;  %2612 = vmatpush.bf16.msra.mxu2 %v3843_v44  ;;  %v2360_v43 = vpop.f32.mrf.mxu2  ;;  %v3923_v44 = vor.u32 %v4991_v29, %v3922_v27  ;;  %v4498_v26 = vld [vmem:[#allocation4 + $0x9a8] sm:$0xf]  ;;  %v5135_v27 = vld [vmem:[#allocation4 + $0x9b4] sm:$0xf0]  ;;  %v4115_v29 = vor.u32 %v5039_v16, %v4114_v14  ;;  %v4371_v31 = vor.u32 %v5103_v24, %v4370_v23 }
  0xf1   :  { %2625 = vmatpush.bf16.msra.mxu3 %v3971_v50  ;;  %v2373_v48 = vpop.f32.mrf.mxu3  ;;  %v5047_v50 = vld [vmem:[#allocation4 + $0x6f4] sm:$0xf0]  ;;  %v4499_v39 = vor.u32 %v5135_v27, %v4498_v26  ;;  %v4210_v54 = vld [vmem:[#allocation4 + $0x768] sm:$0xf] }
  0xf2   :  { %2587 = vmatpush.bf16.msra.mxu0 %v3571_v57  ;;  %v3779_v57 = vor.u32 %v4955_v45, %v3778_v42  ;;  %v4147_v61 = vor.u32 %v5047_v50, %v4146_v49  ;;  %v5067_v41 = vld [vmem:[#allocation4 + $0x794] sm:$0xf0]  ;;  %v4354_v42 = vld [vmem:[#allocation4 + $0x888] sm:$0xf] }
  0xf3   :  { %v5099_v43 = vld [vmem:[#allocation4 + $0x894] sm:$0xf0]  ;;  %v4482_v45 = vld [vmem:[#allocation4 + $0x988] sm:$0xf] }
  0xf4   :  { %2600 = vmatpush.bf16.msra.mxu1 %v3699_v58  ;;  %2613 = vmatpush.bf16.msra.mxu2 %v3827_v59  ;;  %v4530_v58 = vld [vmem:[#allocation4 + $0x9e8] sm:$0xf]  ;;  %v5143_v59 = vld [vmem:[#allocation4 + $0x9f4] sm:$0xf0]  ;;  %v4355_v51 = vor.u32 %v5099_v43, %v4354_v42  ;;  %v4483_v55 = vor.u32 %v5131_v46, %v4482_v45 }
  0xf5   :  { %2626 = vmatpush.bf16.msra.mxu3 %v3955_v32  ;;  %v4130_v32 = vld [vmem:[#allocation4 + $0x6c8] sm:$0xf]  ;;  %v4531_v2 = vor.u32 %v5143_v59, %v4530_v58  ;;  %v5031_v53 = vld [vmem:[#allocation4 + $0x674] sm:$0xf0] }
  0xf6   :  { %2588 = vmatpush.bf16.msra.mxu0 %v3555_v7  ;;  %v5139_v7 = vld [vmem:[#allocation4 + $0x9d4] sm:$0xf0]  ;;  %v4131_v11 = vor.u32 %v5043_v0, %v4130_v32  ;;  %v4338_v58 = vld [vmem:[#allocation4 + $0x868] sm:$0xf] }
  0xf7   :  { %v4515_v19 = vor.u32 %v5139_v7, %v4514_v6  ;;  %v5095_v59 = vld [vmem:[#allocation4 + $0x874] sm:$0xf0]  ;;  %v4066_v32 = vld [vmem:[#allocation4 + $0x648] sm:$0xf] }
  0xf8   :  { %2601 = vmatpush.bf16.msra.mxu1 %v3683_v12  ;;  %2614 = vmatpush.bf16.msra.mxu2 %v3811_v13  ;;  %v4259_v12 = vor.u32 %v5075_v3, %v4258_v1  ;;  %v4387_v13 = vor.u32 %v5107_v5, %v4386_v4  ;;  %v5027_v0 = vld [vmem:[#allocation4 + $0x654] sm:$0xf0]  ;;  %v4194_v1 = vld [vmem:[#allocation4 + $0x748] sm:$0xf] }
  0xf9   :  { %2627 = vmatpush.bf16.msra.mxu3 %v3939_v20  ;;  %v5071_v20 = vld [vmem:[#allocation4 + $0x7b4] sm:$0xf0]  ;;  %v4322_v5 = vld [vmem:[#allocation4 + $0x848] sm:$0xf]  ;;  %v4067_v16 = vor.u32 %v5027_v0, %v4066_v32 }
  0xfa   :  { %2589 = vmatpush.bf16.msra.mxu0 %v3539_v30  ;;  %v4243_v30 = vor.u32 %v5071_v20, %v4242_v18  ;;  %v5059_v4 = vld [vmem:[#allocation4 + $0x754] sm:$0xf0]  ;;  %v4050_v23 = vld [vmem:[#allocation4 + $0x628] sm:$0xf] }
  0xfb   :  { %v5091_v6 = vld [vmem:[#allocation4 + $0x854] sm:$0xf0]  ;;  %v4178_v26 = vld [vmem:[#allocation4 + $0x728] sm:$0xf] }
  0xfc   :  { %2602 = vmatpush.bf16.msra.mxu1 %v3667_v35  ;;  %2615 = vmatpush.bf16.msra.mxu2 %v3795_v36  ;;  %v5035_v35 = vld [vmem:[#allocation4 + $0x694] sm:$0xf0]  ;;  %v4226_v36 = vld [vmem:[#allocation4 + $0x788] sm:$0xf]  ;;  %v4323_v20 = vor.u32 %v5091_v6, %v4322_v5  ;;  %v3364_v6 = vld [vmem:[#allocation4 + $0xd8] sm:$0xf0] }
  0xfd   :  { %2628 = vmatpush.bf16.msra.mxu3 %v3923_v44  ;;  %v4099_v48 = vor.u32 %v5035_v35, %v4098_v33  ;;  %v4227_v50 = vor.u32 %v5067_v41, %v4226_v36  ;;  %v5023_v24 = vld [vmem:[#allocation4 + $0x634] sm:$0xf0]  ;;  %v4434_v33 = vld [vmem:[#allocation4 + $0x928] sm:$0xf] }
  0xfe   :  { %2590 = vmatpush.bf16.msra.mxu0 %v3523_v52  ;;  %v2384_v44 = vpop.f32.mrf.mxu0  ;;  %v4082_v52 = vld [vmem:[#allocation4 + $0x668] sm:$0xf]  ;;  %v5119_v35 = vld [vmem:[#allocation4 + $0x934] sm:$0xf0]  ;;  %v4051_v36 = vor.u32 %v5023_v24, %v4050_v23 }
  0xff   :  { %v2385_v47 = vadd.f32 %v2384_v44, %v5530_v10  ;;  %v5019_v41 = vld [vmem:[#allocation4 + $0x614] sm:$0xf0]  ;;  %v4162_v44 = vld [vmem:[#allocation4 + $0x708] sm:$0xf] }
 0x100   :  { %2603 = vmatpush.bf16.msra.mxu1 %v3651_v56  ;;  %2616 = vmatpush.bf16.msra.mxu2 %v3779_v57  ;;  %v2397_v49 = vpop.f32.mrf.mxu1  ;;  %v5063_v57 = vld [vmem:[#allocation4 + $0x774] sm:$0xf0]  ;;  %v4290_v46 = vld [vmem:[#allocation4 + $0x808] sm:$0xf] }
 0x101   :  { %2629 = vmatpush.bf16.msra.mxu3 %v3907_v60  ;;  %2591 = vmatmul.bf16.vlgmr.msra.gmra.mxu0 %v5478_v8  ;;  %v2398_v56 = vadd.f32 %v2397_v49, %v2385_v47  ;;  %v4466_v60 = vld [vmem:[#allocation4 + $0x968] sm:$0xf]  ;;  %v4211_v10 = vor.u32 %v5063_v57, %v4210_v54  ;;  %v5051_v45 = vld [vmem:[#allocation4 + $0x714] sm:$0xf0]  ;;  %v4435_v47 = vor.u32 %v5119_v35, %v4434_v33  ;;  %v4853_v54 = vld [vmem:[#allocation4 + $0xec] sm:$0xf] }
 0x102   :  { %2635 = vmatpush.bf16.msrb.mxu0 %v4147_v61  ;;  %v5127_v61 = vld [vmem:[#allocation4 + $0x974] sm:$0xf0]  ;;  %v4418_v49 = vld [vmem:[#allocation4 + $0x908] sm:$0xf]  ;;  %v3380_v57 = vld [vmem:[#allocation4 + $0xf8] sm:$0xf0] }
 0x103   :  { %2617 = vmatmul.bf16.vlgmr.msra.gmra.mxu2 %v5492_v37  ;;  %2604 = vmatmul.bf16.vlgmr.msra.gmra.mxu1 %v5482_v15  ;;  %v3383_v0 = vor.u32 %v4853_v54, %v3380_v57  ;;  %v5167_v24 = vld [vmem:[#allocation4 + $0xab4] sm:$0xf0]  ;;  %v3476_v33 = vld [vmem:[#allocation4 + $0x1b8] sm:$0xf0]  ;;  %v4909_v35 = vld [vmem:[#allocation4 + $0x2ac] sm:$0xf] }
 0x104   :  { %2648 = vmatpush.bf16.msrb.mxu1 %v4275_v62  ;;  %2661 = vmatpush.bf16.msrb.mxu2 %v4403_v63  ;;  %v4083_v62 = vor.u32 %v5031_v53, %v4082_v52  ;;  %v4339_v63 = vor.u32 %v5095_v59, %v4338_v58  ;;  %v4658_v52 = vld [vmem:[#allocation4 + $0xae8] sm:$0xf]  ;;  %v5175_v53 = vld [vmem:[#allocation4 + $0xaf4] sm:$0xf0]  ;;  %v4885_v58 = vld [vmem:[#allocation4 + $0x1ec] sm:$0xf] }
 0x105   :  { %2674 = vmatpush.bf16.msrb.mxu3 %v4531_v2  ;;  %v4467_v2 = vor.u32 %v5127_v61, %v4466_v60  ;;  %v3508_v59 = vld [vmem:[#allocation4 + $0x1f8] sm:$0xf0]  ;;  %v4163_v60 = vor.u32 %v5051_v45, %v4162_v44  ;;  %v4659_v32 = vor.u32 %v5175_v53, %v4658_v52  ;;  %v5163_v44 = vld [vmem:[#allocation4 + $0xa94] sm:$0xf0]  ;;  %v4841_v45 = vld [vmem:[#allocation4 + $0x8c] sm:$0xf] }
 0x106   :  { %2630 = vmatmul.bf16.vlgmr.msra.gmra.mxu3 %v5496_v40  ;;  %2636 = vmatpush.bf16.msrb.mxu0 %v4131_v11  ;;  %v2410_v3 = vpop.f32.mrf.mxu2  ;;  %v4450_v11 = vld [vmem:[#allocation4 + $0x948] sm:$0xf]  ;;  %v2386_v14 = vpop.f32.mrf.mxu0  ;;  %v5159_v57 = vld [vmem:[#allocation4 + $0xa74] sm:$0xf0] }
 0x107   :  { %v5537_v7 = vadd.f32 %v2410_v3, %v2398_v56  ;;  %v5171_v3 = vld [vmem:[#allocation4 + $0xad4] sm:$0xf0]  ;;  %v4913_v14 = vld [vmem:[#allocation4 + $0x2cc] sm:$0xf] }
 0x108   :  { %2649 = vmatpush.bf16.msrb.mxu1 %v4259_v12  ;;  %2662 = vmatpush.bf16.msrb.mxu2 %v4387_v13  ;;  %v5123_v12 = vld [vmem:[#allocation4 + $0x954] sm:$0xf0]  ;;  %v2399_v18 = vpop.f32.mrf.mxu1 }
 0x109   :  { %2675 = vmatpush.bf16.msrb.mxu3 %v4515_v19  ;;  %v5539_v13 = vpop.f32.mrf.mxu3  ;;  %v4195_v19 = vor.u32 %v5059_v4, %v4194_v1  ;;  %v4451_v27 = vor.u32 %v5123_v12, %v4450_v11  ;;  %v3511_v1 = vor.u32 %v4885_v58, %v3508_v59  ;;  %v4849_v4 = vld [vmem:[#allocation4 + $0xcc] sm:$0xf]  ;;  %v3492_v12 = vld [vmem:[#allocation4 + $0x1d8] sm:$0xf0] }
 0x10a   :  { %2637 = vmatpush.bf16.msrb.mxu0 %v4115_v29  ;;  %v5055_v29 = vld [vmem:[#allocation4 + $0x734] sm:$0xf0]  ;;  %v4881_v11 = vld [vmem:[#allocation4 + $0x1cc] sm:$0xf] }
 0x10b   :  { %v4179_v42 = vor.u32 %v5055_v29, %v4178_v26  ;;  %v3495_v23 = vor.u32 %v4881_v11, %v3492_v12  ;;  %v4845_v26 = vld [vmem:[#allocation4 + $0xac] sm:$0xf] }
 0x10c   :  { %2650 = vmatpush.bf16.msrb.mxu1 %v4243_v30  ;;  %2663 = vmatpush.bf16.msrb.mxu2 %v4371_v31  ;;  %v4306_v30 = vld [vmem:[#allocation4 + $0x828] sm:$0xf]  ;;  %v5087_v31 = vld [vmem:[#allocation4 + $0x834] sm:$0xf0] }
 0x10d   :  { %2676 = vmatpush.bf16.msrb.mxu3 %v4499_v39  ;;  %v4034_v39 = vld [vmem:[#allocation4 + $0x608] sm:$0xf]  ;;  %v4307_v43 = vor.u32 %v5087_v31, %v4306_v30  ;;  %v3348_v30 = vld [vmem:[#allocation4 + $0xb8] sm:$0xf0]  ;;  %v4877_v31 = vld [vmem:[#allocation4 + $0x1ac] sm:$0xf] }
 0x10e   :  { %2638 = vmatpush.bf16.msrb.mxu0 %v4099_v48  ;;  %v5083_v48 = vld [vmem:[#allocation4 + $0x814] sm:$0xf0]  ;;  %v4035_v56 = vor.u32 %v5019_v41, %v4034_v39  ;;  %v3479_v41 = vor.u32 %v4877_v31, %v3476_v33  ;;  %v4562_v33 = vld [vmem:[#allocation4 + $0xa28] sm:$0xf] }
 0x10f   :  { %v4291_v61 = vor.u32 %v5083_v48, %v4290_v46  ;;  %v4873_v48 = vld [vmem:[#allocation4 + $0x18c] sm:$0xf] }
 0x110   :  { %2651 = vmatpush.bf16.msrb.mxu1 %v4227_v50  ;;  %2664 = vmatpush.bf16.msrb.mxu2 %v4355_v51  ;;  %v5115_v50 = vld [vmem:[#allocation4 + $0x914] sm:$0xf0]  ;;  %v2412_v51 = vpop.f32.mrf.mxu2 }
 0x111   :  { %2677 = vmatpush.bf16.msrb.mxu3 %v4483_v55  ;;  %v2425_v55 = vpop.f32.mrf.mxu3  ;;  %v3588_v51 = vld [vmem:[#allocation4 + $0x298] sm:$0xf0] }
 0x112   :  { %2639 = vmatpush.bf16.msrb.mxu0 %v4083_v62  ;;  %v4917_v62 = vld [vmem:[#allocation4 + $0x2ec] sm:$0xf] }
 0x114   :  { %2652 = vmatpush.bf16.msrb.mxu1 %v4211_v10  ;;  %2665 = vmatpush.bf16.msrb.mxu2 %v4339_v63  ;;  %v3636_v10 = vld [vmem:[#allocation4 + $0x2f8] sm:$0xf0]  ;;  %v4419_v63 = vor.u32 %v5115_v50, %v4418_v49  ;;  %v4905_v50 = vld [vmem:[#allocation4 + $0x28c] sm:$0xf] }
 0x115   :  { %2678 = vmatpush.bf16.msrb.mxu3 %v4467_v2  ;;  %v4642_v2 = vld [vmem:[#allocation4 + $0xac8] sm:$0xf]  ;;  %v3639_v5 = vor.u32 %v4917_v62, %v3636_v10  ;;  %v3460_v49 = vld [vmem:[#allocation4 + $0x198] sm:$0xf0]  ;;  %v4869_v62 = vld [vmem:[#allocation4 + $0x16c] sm:$0xf] }
 0x116   :  { %2640 = vmatpush.bf16.msrb.mxu0 %v4067_v16  ;;  %v3620_v16 = vld [vmem:[#allocation4 + $0x2d8] sm:$0xf0]  ;;  %v4643_v18 = vor.u32 %v5171_v3, %v4642_v2  ;;  %v3463_v55 = vor.u32 %v4873_v48, %v3460_v49  ;;  %v5147_v48 = vld [vmem:[#allocation4 + $0xa14] sm:$0xf0] }
 0x117   :  { %v3623_v29 = vor.u32 %v4913_v14, %v3620_v16  ;;  %v3444_v10 = vld [vmem:[#allocation4 + $0x178] sm:$0xf0]  ;;  %v4865_v16 = vld [vmem:[#allocation4 + $0x14c] sm:$0xf] }
 0x118   :  { %2653 = vmatpush.bf16.msrb.mxu1 %v4195_v19  ;;  %2666 = vmatpush.bf16.msrb.mxu2 %v4323_v20  ;;  %v4626_v19 = vld [vmem:[#allocation4 + $0xaa8] sm:$0xf]  ;;  %v3367_v20 = vor.u32 %v4849_v4, %v3364_v6  ;;  %v3447_v3 = vor.u32 %v4869_v62, %v3444_v10  ;;  %v4833_v6 = vld [vmem:[#allocation4 + $0x4c] sm:$0xf]  ;;  %v3300_v14 = vld [vmem:[#allocation4 + $0x58] sm:$0xf0] }
 0x119   :  { %2679 = vmatpush.bf16.msrb.mxu3 %v4451_v27  ;;  %v504_v27 = vperm.slane %v5520_v28, 1  ;;  %v4627_v39 = vor.u32 %v5167_v24, %v4626_v19  ;;  %v3351_v28 = vor.u32 %v4845_v26, %v3348_v30  ;;  %v4578_v4 = vld [vmem:[#allocation4 + $0xa48] sm:$0xf]  ;;  %v3556_v24 = vld [vmem:[#allocation4 + $0x258] sm:$0xf0]  ;;  %v3303_v30 = vor.u32 %v4833_v6, %v3300_v14 }
 0x11a   :  { %2641 = vmatpush.bf16.msrb.mxu0 %v4051_v36  ;;  %v3604_v36 = vld [vmem:[#allocation4 + $0x2b8] sm:$0xf0] }
 0x11b   :  { %v3607_v46 = vor.u32 %v4909_v35, %v3604_v36  ;;  %v5151_v35 = vld [vmem:[#allocation4 + $0xa34] sm:$0xf0]  ;;  %v4829_v36 = vld [vmem:[#allocation4 + $0x2c] sm:$0xf]  ;;  %v3892_v10 = vld [vmem:[#allocation4 + $0x4f8] sm:$0xf0] }
 0x11c   :  { %2654 = vmatpush.bf16.msrb.mxu1 %v4179_v42  ;;  %2667 = vmatpush.bf16.msrb.mxu2 %v4307_v43  ;;  %v2424_v42 = vadd.f32 %v5539_v13, %v504_v27  ;;  %v4610_v43 = vld [vmem:[#allocation4 + $0xa88] sm:$0xf]  ;;  %v4837_v13 = vld [vmem:[#allocation4 + $0x6c] sm:$0xf]  ;;  %v3748_v14 = vld [vmem:[#allocation4 + $0x3d8] sm:$0xf0] }
 0x11d   :  { %2680 = vmatpush.bf16.msrb.mxu3 %v4435_v47  ;;  %v3332_v47 = vld [vmem:[#allocation4 + $0x98] sm:$0xf0]  ;;  %v4611_v52 = vor.u32 %v5163_v44, %v4610_v43  ;;  %v4893_v44 = vld [vmem:[#allocation4 + $0x22c] sm:$0xf] }
 0x11e   :  { %2642 = vmatpush.bf16.msrb.mxu0 %v4035_v56  ;;  %v2436_v53 = vpop.f32.mrf.mxu0  ;;  %v3335_v54 = vor.u32 %v4841_v45, %v3332_v47  ;;  %v4594_v56 = vld [vmem:[#allocation4 + $0xa68] sm:$0xf]  ;;  %v3412_v43 = vld [vmem:[#allocation4 + $0x138] sm:$0xf0] }
 0x11f   :  { %v2437_v58 = vadd.f32 %v2436_v53, %v2424_v42  ;;  %v4861_v42 = vld [vmem:[#allocation4 + $0x12c] sm:$0xf]  ;;  %v3540_v45 = vld [vmem:[#allocation4 + $0x238] sm:$0xf0]  ;;  %v4546_v47 = vld [vmem:[#allocation4 + $0xa08] sm:$0xf] }
 0x120   :  { %2655 = vmatpush.bf16.msrb.mxu1 %v4163_v60  ;;  %2668 = vmatpush.bf16.msrb.mxu2 %v4291_v61  ;;  %v2449_v59 = vpop.f32.mrf.mxu1  ;;  %v3591_v60 = vor.u32 %v4905_v50, %v3588_v51  ;;  %v3316_v61 = vld [vmem:[#allocation4 + $0x78] sm:$0xf0]  ;;  %v3415_v50 = vor.u32 %v4861_v42, %v3412_v43  ;;  %v4825_v51 = vld [vmem:[#allocation4 + $0xc] sm:$0xf]  ;;  %v4547_v62 = vor.u32 %v5147_v48, %v4546_v47 }
 0x121   :  { %2681 = vmatpush.bf16.msrb.mxu3 %v4419_v63  ;;  %2643 = vmatmul.bf16.vlgmr.msrb.gmra.mxu0 %v5490_v34  ;;  %v4901_v63 = vld [vmem:[#allocation4 + $0x26c] sm:$0xf]  ;;  %v3319_v2 = vor.u32 %v4837_v13, %v3316_v61  ;;  %v3524_v13 = vld [vmem:[#allocation4 + $0x218] sm:$0xf0] }
 0x122   :  { %2687 = vmatpush.bf16.msra.mxu0 %v4659_v32  ;;  %v3572_v32 = vld [vmem:[#allocation4 + $0x278] sm:$0xf0]  ;;  %v4857_v53 = vld [vmem:[#allocation4 + $0x10c] sm:$0xf] }
 0x123   :  { %2669 = vmatmul.bf16.vlgmr.msrb.gmra.mxu2 %v5502_v17  ;;  %2656 = vmatmul.bf16.vlgmr.msrb.gmra.mxu1 %v5494_v38  ;;  %v3575_v12 = vor.u32 %v4901_v63, %v3572_v32  ;;  %v4981_v61 = vld [vmem:[#allocation4 + $0x4ec] sm:$0xf]  ;;  %v4020_v32 = vld [vmem:[#allocation4 + $0x5f8] sm:$0xf0] }
 0x124   :  { %2700 = vmatpush.bf16.msra.mxu1 %v3383_v0  ;;  %2713 = vmatpush.bf16.msra.mxu2 %v3511_v1  ;;  %v2450_v0 = vadd.f32 %v2449_v59, %v2437_v58  ;;  %v4595_v1 = vor.u32 %v5159_v57, %v4594_v56  ;;  %v3396_v56 = vld [vmem:[#allocation4 + $0x118] sm:$0xf0]  ;;  %v4889_v57 = vld [vmem:[#allocation4 + $0x20c] sm:$0xf]  ;;  %v3895_v6 = vor.u32 %v4981_v61, %v3892_v10 }
 0x125   :  { %2726 = vmatpush.bf16.msra.mxu3 %v3639_v5  ;;  %v5155_v5 = vld [vmem:[#allocation4 + $0xa54] sm:$0xf0]  ;;  %v4949_v59 = vld [vmem:[#allocation4 + $0x3ec] sm:$0xf]  ;;  %v3988_v42 = vld [vmem:[#allocation4 + $0x5b8] sm:$0xf0] }
 0x126   :  { %2682 = vmatmul.bf16.vlgmr.msrb.gmra.mxu3 %v5506_v22  ;;  %2688 = vmatpush.bf16.msra.mxu0 %v4643_v18  ;;  %v2462_v11 = vpop.f32.mrf.mxu2  ;;  %v3428_v18 = vld [vmem:[#allocation4 + $0x158] sm:$0xf0]  ;;  %v4579_v26 = vor.u32 %v5155_v5, %v4578_v4  ;;  %v5013_v63 = vld [vmem:[#allocation4 + $0x5ec] sm:$0xf]  ;;  %v3527_v4 = vor.u32 %v4889_v57, %v3524_v13 }
 0x127   :  { %v2463_v19 = vadd.f32 %v2462_v11, %v2450_v0  ;;  %v3431_v31 = vor.u32 %v4865_v16, %v3428_v18  ;;  %v4023_v11 = vor.u32 %v5013_v63, %v4020_v32  ;;  %v4977_v16 = vld [vmem:[#allocation4 + $0x4cc] sm:$0xf]  ;;  %v3828_v63 = vld [vmem:[#allocation4 + $0x478] sm:$0xf0] }
 0x128   :  { %2701 = vmatpush.bf16.msra.mxu1 %v3367_v20  ;;  %2714 = vmatpush.bf16.msra.mxu2 %v3495_v23  ;;  %v4897_v23 = vld [vmem:[#allocation4 + $0x24c] sm:$0xf] }
 0x129   :  { %2727 = vmatpush.bf16.msra.mxu3 %v3623_v29  ;;  %v2475_v20 = vpop.f32.mrf.mxu3  ;;  %v2438_v29 = vpop.f32.mrf.mxu0  ;;  %v5037_v43 = vld [vmem:[#allocation4 + $0x6ac] sm:$0xf] }
 0x12a   :  { %2689 = vmatpush.bf16.msra.mxu0 %v4627_v39  ;;  %v5547_v27 = vadd.f32 %v2475_v20, %v2463_v19  ;;  %v2451_v39 = vpop.f32.mrf.mxu1  ;;  %v3876_v19 = vld [vmem:[#allocation4 + $0x4d8] sm:$0xf0]  ;;  %v5009_v20 = vld [vmem:[#allocation4 + $0x5cc] sm:$0xf] }
 0x12b   :  { %v4937_v48 = vld [vmem:[#allocation4 + $0x38c] sm:$0xf] }
 0x12c   :  { %2702 = vmatpush.bf16.msra.mxu1 %v3351_v28  ;;  %2715 = vmatpush.bf16.msra.mxu2 %v3479_v41  ;;  %v3559_v28 = vor.u32 %v4897_v23, %v3556_v24  ;;  %v3284_v41 = vld [vmem:[#allocation4 + $0x38] sm:$0xf0]  ;;  %v5041_v24 = vld [vmem:[#allocation4 + $0x6cc] sm:$0xf] }
 0x12d   :  { %2728 = vmatpush.bf16.msra.mxu3 %v3607_v46  ;;  %v4563_v46 = vor.u32 %v5151_v35, %v4562_v33  ;;  %v3287_v49 = vor.u32 %v4829_v36, %v3284_v41  ;;  %v4004_v23 = vld [vmem:[#allocation4 + $0x5d8] sm:$0xf0]  ;;  %v4941_v33 = vld [vmem:[#allocation4 + $0x3ac] sm:$0xf] }
 0x12e   :  { %2690 = vmatpush.bf16.msra.mxu0 %v4611_v52  ;;  %v3268_v52 = vld [vmem:[#allocation4 + $0x18] sm:$0xf0]  ;;  %v4973_v36 = vld [vmem:[#allocation4 + $0x4ac] sm:$0xf] }
 0x12f   :  { %v3271_v0 = vor.u32 %v4825_v51, %v3268_v52  ;;  %v3732_v35 = vld [vmem:[#allocation4 + $0x3b8] sm:$0xf0]  ;;  %v5005_v41 = vld [vmem:[#allocation4 + $0x5ac] sm:$0xf] }
 0x130   :  { %2703 = vmatpush.bf16.msra.mxu1 %v3335_v54  ;;  %2716 = vmatpush.bf16.msra.mxu2 %v3463_v55  ;;  %v2464_v54 = vpop.f32.mrf.mxu2  ;;  %v3543_v55 = vor.u32 %v4893_v44, %v3540_v45  ;;  %v4116_v44 = vld [vmem:[#allocation4 + $0x6b8] sm:$0xf0]  ;;  %v3735_v45 = vor.u32 %v4941_v33, %v3732_v35  ;;  %v3991_v47 = vor.u32 %v5005_v41, %v3988_v42  ;;  %v4965_v61 = vld [vmem:[#allocation4 + $0x46c] sm:$0xf] }
 0x131   :  { %2729 = vmatpush.bf16.msra.mxu3 %v3591_v60  ;;  %v2477_v58 = vpop.f32.mrf.mxu3  ;;  %v3764_v60 = vld [vmem:[#allocation4 + $0x3f8] sm:$0xf0]  ;;  %v4119_v51 = vor.u32 %v5037_v43, %v4116_v44  ;;  %v4997_v32 = vld [vmem:[#allocation4 + $0x56c] sm:$0xf] }
 0x132   :  { %2691 = vmatpush.bf16.msra.mxu0 %v4595_v1  ;;  %v3399_v1 = vor.u32 %v4857_v53, %v3396_v56  ;;  %v3767_v5 = vor.u32 %v4949_v59, %v3764_v60  ;;  %v3844_v52 = vld [vmem:[#allocation4 + $0x498] sm:$0xf0]  ;;  %v5001_v53 = vld [vmem:[#allocation4 + $0x58c] sm:$0xf] }
 0x133   :  { %v3972_v54 = vld [vmem:[#allocation4 + $0x598] sm:$0xf0]  ;;  %v4933_v59 = vld [vmem:[#allocation4 + $0x36c] sm:$0xf] }
 0x134   :  { %2704 = vmatpush.bf16.msra.mxu1 %v3319_v2  ;;  %2717 = vmatpush.bf16.msra.mxu2 %v3447_v3  ;;  %v5045_v2 = vld [vmem:[#allocation4 + $0x6ec] sm:$0xf]  ;;  %v4148_v3 = vld [vmem:[#allocation4 + $0x6f8] sm:$0xf0]  ;;  %v3975_v58 = vor.u32 %v5001_v53, %v3972_v54 }
 0x135   :  { %2730 = vmatpush.bf16.msra.mxu3 %v3575_v12  ;;  %v4945_v12 = vld [vmem:[#allocation4 + $0x3cc] sm:$0xf]  ;;  %v4151_v18 = vor.u32 %v5045_v2, %v4148_v3  ;;  %v4100_v56 = vld [vmem:[#allocation4 + $0x698] sm:$0xf0] }
 0x136   :  { %2692 = vmatpush.bf16.msra.mxu0 %v4579_v26  ;;  %v4132_v26 = vld [vmem:[#allocation4 + $0x6d8] sm:$0xf0]  ;;  %v3751_v29 = vor.u32 %v4945_v12, %v3748_v14  ;;  %v4957_v41 = vld [vmem:[#allocation4 + $0x42c] sm:$0xf] }
 0x137   :  { %v4135_v39 = vor.u32 %v5041_v24, %v4132_v26  ;;  %v3700_v60 = vld [vmem:[#allocation4 + $0x378] sm:$0xf0]  ;;  %v5025_v24 = vld [vmem:[#allocation4 + $0x64c] sm:$0xf] }
 0x138   :  { %2705 = vmatpush.bf16.msra.mxu1 %v3303_v30  ;;  %2718 = vmatpush.bf16.msra.mxu2 %v3431_v31  ;;  %v3879_v30 = vor.u32 %v4977_v16, %v3876_v19  ;;  %v4007_v31 = vor.u32 %v5009_v20, %v4004_v23  ;;  %v4084_v2 = vld [vmem:[#allocation4 + $0x678] sm:$0xf0]  ;;  %v3703_v3 = vor.u32 %v4933_v59, %v3700_v60  ;;  %v4989_v44 = vld [vmem:[#allocation4 + $0x52c] sm:$0xf] }
 0x139   :  { %2731 = vmatpush.bf16.msra.mxu3 %v3559_v28  ;;  %v3860_v28 = vld [vmem:[#allocation4 + $0x4b8] sm:$0xf0]  ;;  %v4953_v53 = vld [vmem:[#allocation4 + $0x40c] sm:$0xf] }
 0x13a   :  { %2693 = vmatpush.bf16.msra.mxu0 %v4563_v46  ;;  %v3863_v46 = vor.u32 %v4973_v36, %v3860_v28  ;;  %v3812_v16 = vld [vmem:[#allocation4 + $0x458] sm:$0xf0]  ;;  %v5109_v59 = vld [vmem:[#allocation4 + $0x8ec] sm:$0xf] }
 0x13b   :  { %v3940_v19 = vld [vmem:[#allocation4 + $0x558] sm:$0xf0] }
 0x13c   :  { %2706 = vmatpush.bf16.msra.mxu1 %v3287_v49  ;;  %2719 = vmatpush.bf16.msra.mxu2 %v3415_v50  ;;  %v3716_v49 = vld [vmem:[#allocation4 + $0x398] sm:$0xf0]  ;;  %v4969_v50 = vld [vmem:[#allocation4 + $0x48c] sm:$0xf] }
 0x13d   :  { %2732 = vmatpush.bf16.msra.mxu3 %v3543_v55  ;;  %v3719_v57 = vor.u32 %v4937_v48, %v3716_v49  ;;  %v3847_v13 = vor.u32 %v4969_v50, %v3844_v52  ;;  %v4068_v26 = vld [vmem:[#allocation4 + $0x658] sm:$0xf0]  ;;  %v4921_v49 = vld [vmem:[#allocation4 + $0x30c] sm:$0xf] }
 0x13e   :  { %2694 = vmatpush.bf16.msra.mxu0 %v4547_v62  ;;  %v2488_v55 = vpop.f32.mrf.mxu0  ;;  %v3668_v28 = vld [vmem:[#allocation4 + $0x338] sm:$0xf0]  ;;  %v4071_v42 = vor.u32 %v5025_v24, %v4068_v26 }
 0x13f   :  { %v3796_v43 = vld [vmem:[#allocation4 + $0x438] sm:$0xf0] }
 0x140   :  { %2707 = vmatpush.bf16.msra.mxu1 %v3271_v0  ;;  %2720 = vmatpush.bf16.msra.mxu2 %v3399_v1  ;;  %v3956_v0 = vld [vmem:[#allocation4 + $0x578] sm:$0xf0]  ;;  %v5029_v1 = vld [vmem:[#allocation4 + $0x66c] sm:$0xf] }
 0x141   :  { %2733 = vmatpush.bf16.msra.mxu3 %v3527_v4  ;;  %2695 = vmatmul.bf16.vlgmr.msra.gmra.mxu0 %v5504_v21  ;;  %v3959_v4 = vor.u32 %v4997_v32, %v3956_v0  ;;  %v4087_v12 = vor.u32 %v5029_v1, %v4084_v2  ;;  %v3652_v50 = vld [vmem:[#allocation4 + $0x318] sm:$0xf0]  ;;  %v5173_v1 = vld [vmem:[#allocation4 + $0xaec] sm:$0xf] }
 0x142   :  { %2739 = vmatpush.bf16.msrb.mxu0 %v3767_v5  ;;  %v4929_v5 = vld [vmem:[#allocation4 + $0x34c] sm:$0xf]  ;;  %v3780_v54 = vld [vmem:[#allocation4 + $0x418] sm:$0xf0] }
 0x143   :  { %2721 = vmatmul.bf16.vlgmr.msra.gmra.mxu2 %v5487_v25  ;;  %2708 = vmatmul.bf16.vlgmr.msra.gmra.mxu1 %v5480_v9  ;;  %v5033_v25 = vld [vmem:[#allocation4 + $0x68c] sm:$0xf]  ;;  %v2501_v9 = vpop.f32.mrf.mxu1  ;;  %v3783_v32 = vor.u32 %v4953_v53, %v3780_v54  ;;  %v4660_v2 = vld [vmem:[#allocation4 + $0xaf8] sm:$0xf0] }
 0x144   :  { %2752 = vmatpush.bf16.msrb.mxu1 %v3895_v6  ;;  %2765 = vmatpush.bf16.msrb.mxu2 %v4023_v11  ;;  %v4103_v62 = vor.u32 %v5033_v25, %v4100_v56  ;;  %v3684_v6 = vld [vmem:[#allocation4 + $0x358] sm:$0xf0]  ;;  %v4961_v11 = vld [vmem:[#allocation4 + $0x44c] sm:$0xf] }
 0x145   :  { %2778 = vmatpush.bf16.msrb.mxu3 %v4151_v18  ;;  %v4993_v18 = vld [vmem:[#allocation4 + $0x54c] sm:$0xf]  ;;  %v3815_v35 = vor.u32 %v4961_v11, %v3812_v16  ;;  %v3908_v56 = vld [vmem:[#allocation4 + $0x518] sm:$0xf0] }
 0x146   :  { %2734 = vmatmul.bf16.vlgmr.msra.gmra.mxu3 %v5478_v8  ;;  %2740 = vmatpush.bf16.msrb.mxu0 %v3751_v29  ;;  %v2489_v8 = vadd.f32 %v2488_v55, %v5547_v27  ;;  %v3831_v27 = vor.u32 %v4965_v61, %v3828_v63  ;;  %v2514_v14 = vpop.f32.mrf.mxu2  ;;  %v2490_v29 = vpop.f32.mrf.mxu0  ;;  %v3943_v36 = vor.u32 %v4993_v18, %v3940_v19  ;;  %v4985_v55 = vld [vmem:[#allocation4 + $0x50c] sm:$0xf]  ;;  %v4532_v63 = vld [vmem:[#allocation4 + $0x9f8] sm:$0xf0] }
 0x147   :  { %v3655_v61 = vor.u32 %v4921_v49, %v3652_v50  ;;  %v3911_v0 = vor.u32 %v4985_v55, %v3908_v56  ;;  %v4260_v11 = vld [vmem:[#allocation4 + $0x7d8] sm:$0xf0]  ;;  %v5137_v18 = vld [vmem:[#allocation4 + $0x9cc] sm:$0xf] }
 0x148   :  { %2753 = vmatpush.bf16.msrb.mxu1 %v3879_v30  ;;  %2766 = vmatpush.bf16.msrb.mxu2 %v4007_v31  ;;  %v2502_v10 = vadd.f32 %v2501_v9, %v2489_v8  ;;  %v3687_v30 = vor.u32 %v4929_v5, %v3684_v6  ;;  %v5017_v8 = vld [vmem:[#allocation4 + $0x60c] sm:$0xf]  ;;  %v4388_v16 = vld [vmem:[#allocation4 + $0x8d8] sm:$0xf0] }
 0x149   :  { %2779 = vmatpush.bf16.msrb.mxu3 %v4135_v39  ;;  %v2527_v23 = vpop.f32.mrf.mxu3  ;;  %v4925_v39 = vld [vmem:[#allocation4 + $0x32c] sm:$0xf]  ;;  %v4516_v19 = vld [vmem:[#allocation4 + $0x9d8] sm:$0xf0] }
 0x14a   :  { %2741 = vmatpush.bf16.msrb.mxu0 %v3735_v45  ;;  %v2515_v20 = vadd.f32 %v2514_v14, %v2502_v10  ;;  %v3924_v45 = vld [vmem:[#allocation4 + $0x538] sm:$0xf0]  ;;  %v3671_v48 = vor.u32 %v4925_v39, %v3668_v28  ;;  %v5141_v10 = vld [vmem:[#allocation4 + $0x9ec] sm:$0xf]  ;;  %v4663_v14 = vor.u32 %v5173_v1, %v4660_v2  ;;  %v4519_v29 = vor.u32 %v5137_v18, %v4516_v19 }
 0x14b   :  { %v2503_v31 = vpop.f32.mrf.mxu1  ;;  %v3927_v52 = vor.u32 %v4989_v44, %v3924_v45  ;;  %v4535_v5 = vor.u32 %v5141_v10, %v4532_v63  ;;  %v5073_v6 = vld [vmem:[#allocation4 + $0x7cc] sm:$0xf]  ;;  %v4372_v39 = vld [vmem:[#allocation4 + $0x8b8] sm:$0xf0] }
 0x14c   :  { %2754 = vmatpush.bf16.msrb.mxu1 %v3863_v46  ;;  %2767 = vmatpush.bf16.msrb.mxu2 %v3991_v47  ;;  %v5554_v33 = vadd.f32 %v2527_v23, %v2515_v20  ;;  %v5021_v46 = vld [vmem:[#allocation4 + $0x62c] sm:$0xf]  ;;  %v4052_v47 = vld [vmem:[#allocation4 + $0x638] sm:$0xf0]  ;;  %v4263_v24 = vor.u32 %v5073_v6, %v4260_v11 }
 0x14d   :  { %2780 = vmatpush.bf16.msrb.mxu3 %v4119_v51  ;;  %v3799_v51 = vor.u32 %v4957_v41, %v3796_v43  ;;  %v4055_v25 = vor.u32 %v5021_v46, %v4052_v47  ;;  %v5169_v20 = vld [vmem:[#allocation4 + $0xacc] sm:$0xf]  ;;  %v4644_v23 = vld [vmem:[#allocation4 + $0xad8] sm:$0xf0] }
 0x14e   :  { %2742 = vmatpush.bf16.msrb.mxu0 %v3719_v57  ;;  %v4036_v57 = vld [vmem:[#allocation4 + $0x618] sm:$0xf0]  ;;  %v2516_v9 = vpop.f32.mrf.mxu2  ;;  %v5133_v28 = vld [vmem:[#allocation4 + $0x9ac] sm:$0xf] }
 0x14f   :  { %v4244_v31 = vld [vmem:[#allocation4 + $0x7b8] sm:$0xf0]  ;;  %v5065_v47 = vld [vmem:[#allocation4 + $0x78c] sm:$0xf] }
 0x150   :  { %2755 = vmatpush.bf16.msrb.mxu1 %v3847_v13  ;;  %2768 = vmatpush.bf16.msrb.mxu2 %v3975_v58  ;;  %v5077_v13 = vld [vmem:[#allocation4 + $0x7ec] sm:$0xf]  ;;  %v4276_v58 = vld [vmem:[#allocation4 + $0x7f8] sm:$0xf0] }
 0x151   :  { %2781 = vmatpush.bf16.msrb.mxu3 %v4103_v62  ;;  %v2529_v60 = vpop.f32.mrf.mxu3  ;;  %v4404_v62 = vld [vmem:[#allocation4 + $0x8f8] sm:$0xf0]  ;;  %v5061_v56 = vld [vmem:[#allocation4 + $0x76c] sm:$0xf] }
 0x152   :  { %2743 = vmatpush.bf16.msrb.mxu0 %v3703_v3  ;;  %v4039_v3 = vor.u32 %v5017_v8, %v4036_v57  ;;  %v4500_v41 = vld [vmem:[#allocation4 + $0x9b8] sm:$0xf0]  ;;  %v5093_v57 = vld [vmem:[#allocation4 + $0x86c] sm:$0xf] }
 0x153   :  { %v4628_v43 = vld [vmem:[#allocation4 + $0xab8] sm:$0xf0]  ;;  %v4503_v46 = vor.u32 %v5133_v28, %v4500_v41  ;;  %v5157_v60 = vld [vmem:[#allocation4 + $0xa6c] sm:$0xf] }
 0x154   :  { %2756 = vmatpush.bf16.msrb.mxu1 %v3831_v27  ;;  %2769 = vmatpush.bf16.msrb.mxu2 %v3959_v4  ;;  %v4279_v27 = vor.u32 %v5077_v13, %v4276_v58  ;;  %v4407_v4 = vor.u32 %v5109_v59, %v4404_v62  ;;  %v4356_v50 = vld [vmem:[#allocation4 + $0x898] sm:$0xf0]  ;;  %v5125_v58 = vld [vmem:[#allocation4 + $0x96c] sm:$0xf] }
 0x155   :  { %2782 = vmatpush.bf16.msrb.mxu3 %v4087_v12  ;;  %v5105_v12 = vld [vmem:[#allocation4 + $0x8cc] sm:$0xf]  ;;  %v4212_v8 = vld [vmem:[#allocation4 + $0x778] sm:$0xf0] }
 0x156   :  { %2744 = vmatpush.bf16.msrb.mxu0 %v3687_v30  ;;  %v4391_v26 = vor.u32 %v5105_v12, %v4388_v16  ;;  %v5069_v30 = vld [vmem:[#allocation4 + $0x7ac] sm:$0xf]  ;;  %v4340_v13 = vld [vmem:[#allocation4 + $0x878] sm:$0xf0]  ;;  %v4215_v62 = vor.u32 %v5061_v56, %v4212_v8  ;;  %v5182_v8 = vld [vmem:[#allocation7 + $0x30] sm:$0xff] }
 0x157   :  { %v4247_v44 = vor.u32 %v5069_v30, %v4244_v31  ;;  %v4468_v59 = vld [vmem:[#allocation4 + $0x978] sm:$0xf0]  ;;  %v4343_v10 = vor.u32 %v5093_v57, %v4340_v13  ;;  %v5089_v1 = vld [vmem:[#allocation4 + $0x84c] sm:$0xf]  ;;  %v5190_v57 = vld [vmem:[#allocation7 + $0x70] sm:$0xff] }
 0x158   :  { %2757 = vmatpush.bf16.msrb.mxu1 %v3815_v35  ;;  %2770 = vmatpush.bf16.msrb.mxu2 %v3943_v36  ;;  %v5101_v35 = vld [vmem:[#allocation4 + $0x8ac] sm:$0xf]  ;;  %v4647_v36 = vor.u32 %v5169_v20, %v4644_v23  ;;  %v4471_v63 = vor.u32 %v5125_v58, %v4468_v59  ;;  %v4580_v11 = vld [vmem:[#allocation4 + $0xa58] sm:$0xf0]  ;;  %v5180_v58 = vld [vmem:[#allocation7 + $0x20] sm:$0xff] }
 0x159   :  { %2783 = vmatpush.bf16.msrb.mxu3 %v4071_v42  ;;  %v5165_v42 = vld [vmem:[#allocation4 + $0xaac] sm:$0xf]  ;;  %v4375_v45 = vor.u32 %v5101_v35, %v4372_v39  ;;  %v4308_v30 = vld [vmem:[#allocation4 + $0x838] sm:$0xf0] }
 0x15a   :  { %2745 = vmatpush.bf16.msrb.mxu0 %v3671_v48  ;;  %v4228_v48 = vld [vmem:[#allocation4 + $0x798] sm:$0xf0]  ;;  %v4631_v49 = vor.u32 %v5165_v42, %v4628_v43  ;;  %v5153_v6 = vld [vmem:[#allocation4 + $0xa4c] sm:$0xf] }
 0x15b   :  { %v4231_v54 = vor.u32 %v5065_v47, %v4228_v48  ;;  %v5053_v23 = vld [vmem:[#allocation4 + $0x72c] sm:$0xf]  ;;  %v4436_v35 = vld [vmem:[#allocation4 + $0x938] sm:$0xf0] }
 0x15c   :  { %2758 = vmatpush.bf16.msrb.mxu1 %v3799_v51  ;;  %2771 = vmatpush.bf16.msrb.mxu2 %v3927_v52  ;;  %v5129_v51 = vld [vmem:[#allocation4 + $0x98c] sm:$0xf]  ;;  %v4484_v52 = vld [vmem:[#allocation4 + $0x998] sm:$0xf0] }
 0x15d   :  { %2784 = vmatpush.bf16.msrb.mxu3 %v4055_v25  ;;  %v4487_v25 = vor.u32 %v5129_v51, %v4484_v52  ;;  %v5117_v31 = vld [vmem:[#allocation4 + $0x92c] sm:$0xf]  ;;  %v4564_v39 = vld [vmem:[#allocation4 + $0xa38] sm:$0xf0] }
 0x15e   :  { %2746 = vmatpush.bf16.msrb.mxu0 %v3655_v61  ;;  %v5560_v53 = vpop.f32.mrf.mxu0  ;;  %v4596_v61 = vld [vmem:[#allocation4 + $0xa78] sm:$0xf0]  ;;  %v4439_v42 = vor.u32 %v5117_v31, %v4436_v35  ;;  %v5049_v43 = vld [vmem:[#allocation4 + $0x70c] sm:$0xf] }
 0x15f   :  { %v4599_v2 = vor.u32 %v5157_v60, %v4596_v61  ;;  %v4292_v47 = vld [vmem:[#allocation4 + $0x818] sm:$0xf0]  ;;  %v5113_v48 = vld [vmem:[#allocation4 + $0x90c] sm:$0xf]  ;;  %v5188_v61 = vld [vmem:[#allocation7 + $0x60] sm:$0xff] }
 0x160   :  { %2759 = vmatpush.bf16.msrb.mxu1 %v3783_v32  ;;  %2772 = vmatpush.bf16.msrb.mxu2 %v3911_v0  ;;  %v5562_v55 = vpop.f32.mrf.mxu1  ;;  %v5057_v32 = vld [vmem:[#allocation4 + $0x74c] sm:$0xf]  ;;  %v4196_v0 = vld [vmem:[#allocation4 + $0x758] sm:$0xf0] }
 0x161   :  { %2785 = vmatpush.bf16.msrb.mxu3 %v4039_v3  ;;  %2747 = vmatmul.bf16.vlgmr.msrb.gmra.mxu0 %v5482_v15  ;;  %v5161_v15 = vld [vmem:[#allocation4 + $0xa8c] sm:$0xf]  ;;  %v4324_v3 = vld [vmem:[#allocation4 + $0x858] sm:$0xf0]  ;;  %v4199_v16 = vor.u32 %v5057_v32, %v4196_v0  ;;  %v5186_v0 = vld [vmem:[#allocation7 + $0x50] sm:$0xff] }
 0x162   :  { %2791 = vmatpush.bf16.msra.mxu0 %v4279_v27  ;;  %v5121_v27 = vld [vmem:[#allocation4 + $0x94c] sm:$0xf]  ;;  %v4327_v19 = vor.u32 %v5089_v1, %v4324_v3  ;;  %v4548_v51 = vld [vmem:[#allocation4 + $0xa18] sm:$0xf0]  ;;  %v2541_v3 = vadd.f32 %v5560_v53, %v5554_v33  ;;  %v5194_v53 = vld [vmem:[#allocation7 + $0x90] sm:$0xff] }
 0x163   :  { %2773 = vmatmul.bf16.vlgmr.msrb.gmra.mxu2 %v5496_v40  ;;  %2760 = vmatmul.bf16.vlgmr.msrb.gmra.mxu1 %v5492_v37  ;;  %v5097_v40 = vld [vmem:[#allocation4 + $0x88c] sm:$0xf]  ;;  %v5191_v56 = vld [vmem:[#allocation7 + $0x78] sm:$0xff] }
 0x164   :  { %2804 = vmatpush.bf16.msra.mxu1 %v4407_v4  ;;  %2817 = vmatpush.bf16.msra.mxu2 %v4535_v5  ;;  %v4359_v37 = vor.u32 %v5097_v40, %v4356_v50  ;;  %v4452_v4 = vld [vmem:[#allocation4 + $0x958] sm:$0xf0]  ;;  %v5145_v50 = vld [vmem:[#allocation4 + $0xa0c] sm:$0xf] }
 0x165   :  { %2830 = vmatpush.bf16.msra.mxu3 %v4663_v14  ;;  %v4455_v20 = vor.u32 %v5121_v27, %v4452_v4  ;;  %v4420_v40 = vld [vmem:[#allocation4 + $0x918] sm:$0xf0]  ;;  %v5189_v13 = vld [vmem:[#allocation7 + $0x68] sm:$0xff] }
 0x166   :  { %2786 = vmatmul.bf16.vlgmr.msrb.gmra.mxu3 %v5490_v34  ;;  %2792 = vmatpush.bf16.msra.mxu0 %v4263_v24  ;;  %v4612_v34 = vld [vmem:[#allocation4 + $0xa98] sm:$0xf0]  ;;  %v5564_v5 = vpop.f32.mrf.mxu2  ;;  %v2542_v14 = vpop.f32.mrf.mxu0  ;;  %v5177_v27 = vld [vmem:[#allocation7 + $0x8] sm:$0xff] }
 0x167   :  { %v4615_v9 = vor.u32 %v5161_v15, %v4612_v34  ;;  %v4180_v24 = vld [vmem:[#allocation4 + $0x738] sm:$0xf0]  ;;  %v5185_v4 = vld [vmem:[#allocation7 + $0x48] sm:$0xff]  ;;  %v2554_v14 = vadd.f32 %v5562_v55, %v2541_v3 }
 0x168   :  { %2805 = vmatpush.bf16.msra.mxu1 %v4391_v26  ;;  %2818 = vmatpush.bf16.msra.mxu2 %v4519_v29  ;;  %v2555_v18 = vpop.f32.mrf.mxu1  ;;  %v5085_v26 = vld [vmem:[#allocation4 + $0x82c] sm:$0xf]  ;;  %v4583_v29 = vor.u32 %v5153_v6, %v4580_v11  ;;  %v4183_v28 = vor.u32 %v5053_v23, %v4180_v24  ;;  %v5199_v60 = vld [vmem:[#allocation7 + $0xb8] sm:$0xff]  ;;  %v5196_v11 = vld [vmem:[#allocation7 + $0xa0] sm:$0xff] }
 0x169   :  { %2831 = vmatpush.bf16.msra.mxu3 %v4647_v36  ;;  %v5566_v12 = vpop.f32.mrf.mxu3  ;;  %v5149_v36 = vld [vmem:[#allocation4 + $0xa2c] sm:$0xf]  ;;  %v4311_v41 = vor.u32 %v5085_v26, %v4308_v30  ;;  %v5176_v18 = vld [vmem:[#allocation7] sm:$0xff]  ;;  %v5195_v23 = vld [vmem:[#allocation7 + $0x98] sm:$0xff]  ;;  %v2844_v24 = vmax.f32 %v2554_v14, 0.0 }
 0x16a   :  { %2793 = vmatpush.bf16.msra.mxu0 %v4247_v44  ;;  %v4164_v44 = vld [vmem:[#allocation4 + $0x718] sm:$0xf0]  ;;  %v5193_v31 = vld [vmem:[#allocation7 + $0x88] sm:$0xff] }
 0x16b   :  { %v4167_v15 = vor.u32 %v5049_v43, %v4164_v44  ;;  %v2848_v26 = vpack.c.bf16 %v2844_v24, %v2844_v24 }
 0x16c   :  { %2806 = vmatpush.bf16.msra.mxu1 %v4375_v45  ;;  %2819 = vmatpush.bf16.msra.mxu2 %v4503_v46  ;;  %v5081_v45 = vld [vmem:[#allocation4 + $0x80c] sm:$0xf]  ;;  %v4567_v46 = vor.u32 %v5149_v36, %v4564_v39  ;;  %v5192_v39 = vld [vmem:[#allocation7 + $0x80] sm:$0xff] }
 0x16d   :  { %2832 = vmatpush.bf16.msra.mxu3 %v4631_v49  ;;  %v4295_v34 = vor.u32 %v5081_v45, %v4292_v47 }
 0x16e   :  { %2794 = vmatpush.bf16.msra.mxu0 %v4231_v54  ;;  %v2568_v49 = vpop.f32.mrf.mxu2  ;;  %v4423_v54 = vor.u32 %v5113_v48, %v4420_v40 }
 0x170   :  { %2807 = vmatpush.bf16.msra.mxu1 %v4359_v37  ;;  %2820 = vmatpush.bf16.msra.mxu2 %v4487_v25  ;;  %v4551_v37 = vor.u32 %v5145_v50, %v4548_v51  ;;  %v5183_v25 = vld [vmem:[#allocation7 + $0x38] sm:$0xff] }
 0x171   :  { %2833 = vmatpush.bf16.msra.mxu3 %v4615_v9  ;;  %v2581_v52 = vpop.f32.mrf.mxu3  ;;  %v5181_v9 = vld [vmem:[#allocation7 + $0x28] sm:$0xff] }
 0x172   :  { %2795 = vmatpush.bf16.msra.mxu0 %v4215_v62 }
 0x174   :  { %2808 = vmatpush.bf16.msra.mxu1 %v4343_v10  ;;  %2821 = vmatpush.bf16.msra.mxu2 %v4471_v63  ;;  %v5198_v63 = vld [vmem:[#allocation7 + $0xb0] sm:$0xff] }
 0x175   :  { %2834 = vmatpush.bf16.msra.mxu3 %v4599_v2  ;;  %v5197_v2 = vld [vmem:[#allocation7 + $0xa8] sm:$0xff] }
 0x176   :  { %2796 = vmatpush.bf16.msra.mxu0 %v4199_v16 }
 0x178   :  { %2809 = vmatpush.bf16.msra.mxu1 %v4327_v19  ;;  %2822 = vmatpush.bf16.msra.mxu2 %v4455_v20  ;;  %v2843_v19 = vmax.f32 %v5537_v7, 0.0  ;;  %v5184_v20 = vld [vmem:[#allocation7 + $0x40] sm:$0xff] }
 0x179   :  { %2835 = vmatpush.bf16.msra.mxu3 %v4583_v29  ;;  %v5229_v29 = vld [vmem:[#allocation6] sm:$0xf] }
 0x17a   :  { %2797 = vmatpush.bf16.msra.mxu0 %v4183_v28  ;;  %v2847_v33 = vpack.c.bf16 %v2843_v19, %v2843_v19  ;;  %v505_v30 = vperm.slane %v5229_v29, 2 }
 0x17c   :  { %2810 = vmatpush.bf16.msra.mxu1 %v4311_v41  ;;  %2823 = vmatpush.bf16.msra.mxu2 %v4439_v42  ;;  %v2567_v55 = vadd.f32 %v5564_v5, %v505_v30 }
 0x17d   :  { %2836 = vmatpush.bf16.msra.mxu3 %v4567_v46 }
 0x17e   :  { %2798 = vmatpush.bf16.msra.mxu0 %v4167_v15  ;;  %v2592_v59 = vpop.f32.mrf.mxu0  ;;  %v2580_v35 = vadd.f32 %v5566_v12, %v2567_v55 }
 0x180   :  { %2811 = vmatpush.bf16.msra.mxu1 %v4295_v34  ;;  %2824 = vmatpush.bf16.msra.mxu2 %v4423_v54  ;;  %v2605_v62 = vpop.f32.mrf.mxu1  ;;  %v2593_v28 = vadd.f32 %v2592_v59, %v2580_v35 }
 0x181   :  { %2837 = vmatpush.bf16.msra.mxu3 %v4551_v37  ;;  %2799 = vmatmul.bf16.vlgmr.msra.gmra.mxu0 %v5494_v38  ;;  %v5179_v38 = vld [vmem:[#allocation7 + $0x18] sm:$0xff] }
 0x182   :  { %3111 = vmatpush.bf16.msrb.mxu0 %v5183_v25  ;;  %v2606_v44 = vadd.f32 %v2605_v62, %v2593_v28  ;;  %v5202_v62 = vld [vmem:[#allocation7 + $0xd0] sm:$0xff] }
 0x183   :  { %2812 = vmatmul.bf16.vlgmr.msra.gmra.mxu1 %v5502_v17  ;;  %2825 = vmatmul.bf16.vlgmr.msra.gmra.mxu2 %v5506_v22  ;;  %v5187_v17 = vld [vmem:[#allocation7 + $0x58] sm:$0xff] }
 0x184   :  { %3124 = vmatpush.bf16.msrb.mxu1 %v5191_v56  ;;  %2838 = vmatmul.bf16.vlgmr.msra.gmra.mxu3 %v5504_v21  ;;  %v5178_v21 = vld [vmem:[#allocation7 + $0x10] sm:$0xff]  ;;  %v5207_v56 = vld [vmem:[#allocation7 + $0xf8] sm:$0xff] }
 0x185   :  { %3137 = vmatpush.bf16.msrb.mxu2 %v5199_v60  ;;  %3150 = vmatpush.bf16.msrb.mxu3 %v5207_v56  ;;  %v5204_v60 = vld [vmem:[#allocation7 + $0xe0] sm:$0xff] }
 0x186   :  { %3112 = vmatpush.bf16.msrb.mxu0 %v5182_v8  ;;  %v2618_v10 = vpop.f32.mrf.mxu2  ;;  %v2594_v32 = vpop.f32.mrf.mxu0 }
 0x187   :  { %v2619_v46 = vadd.f32 %v2618_v10, %v2606_v44 }
 0x188   :  { %3125 = vmatpush.bf16.msrb.mxu1 %v5190_v57  ;;  %v2607_v1 = vpop.f32.mrf.mxu1  ;;  %v5206_v57 = vld [vmem:[#allocation7 + $0xf0] sm:$0xff] }
 0x189   :  { %v2631_v22 = vpop.f32.mrf.mxu3  ;;  %3138 = vmatpush.bf16.msrb.mxu2 %v5198_v63  ;;  %3151 = vmatpush.bf16.msrb.mxu3 %v5206_v57  ;;  %v5201_v63 = vld [vmem:[#allocation7 + $0xc8] sm:$0xff] }
 0x18a   :  { %3113 = vmatpush.bf16.msrb.mxu0 %v5181_v9  ;;  %v2632_v40 = vadd.f32 %v2631_v22, %v2619_v46  ;;  %v5215_v46 = vld [vmem:[#allocation10 + $0x38] sm:$0xff] }
 0x18c   :  { %3126 = vmatpush.bf16.msrb.mxu1 %v5189_v13  ;;  %v5205_v13 = vld [vmem:[#allocation7 + $0xe8] sm:$0xff] }
 0x18d   :  { %3139 = vmatpush.bf16.msrb.mxu2 %v5197_v2  ;;  %3152 = vmatpush.bf16.msrb.mxu3 %v5205_v13  ;;  %v5200_v2 = vld [vmem:[#allocation7 + $0xc0] sm:$0xff] }
 0x18e   :  { %3114 = vmatpush.bf16.msrb.mxu0 %v5180_v58  ;;  %v2620_v6 = vpop.f32.mrf.mxu2 }
 0x190   :  { %3127 = vmatpush.bf16.msrb.mxu1 %v5188_v61  ;;  %v5203_v61 = vld [vmem:[#allocation7 + $0xd8] sm:$0xff] }
 0x191   :  { %v2633_v16 = vpop.f32.mrf.mxu3  ;;  %3140 = vmatpush.bf16.msrb.mxu2 %v5196_v11  ;;  %3153 = vmatpush.bf16.msrb.mxu3 %v5204_v60 }
 0x192   :  { %3115 = vmatpush.bf16.msrb.mxu0 %v5179_v38  ;;  %v506_v38 = vperm.slane %v5229_v29, 3 }
 0x194   :  { %3128 = vmatpush.bf16.msrb.mxu1 %v5187_v17 }
 0x195   :  { %3141 = vmatpush.bf16.msrb.mxu2 %v5195_v23  ;;  %3154 = vmatpush.bf16.msrb.mxu3 %v5203_v61 }
 0x196   :  { %3116 = vmatpush.bf16.msrb.mxu0 %v5178_v21 }
 0x198   :  { %3129 = vmatpush.bf16.msrb.mxu1 %v5186_v0 }
 0x199   :  { %3142 = vmatpush.bf16.msrb.mxu2 %v5194_v53  ;;  %3155 = vmatpush.bf16.msrb.mxu3 %v5202_v62 }
 0x19a   :  { %3117 = vmatpush.bf16.msrb.mxu0 %v5177_v27 }
 0x19c   :  { %3130 = vmatpush.bf16.msrb.mxu1 %v5185_v4 }
 0x19d   :  { %3143 = vmatpush.bf16.msrb.mxu2 %v5193_v31  ;;  %3156 = vmatpush.bf16.msrb.mxu3 %v5201_v63 }
 0x19e   :  { %3118 = vmatpush.bf16.msrb.mxu0 %v5176_v18  ;;  %v2644_v7 = vpop.f32.mrf.mxu0 }
 0x19f   :  { %v2645_v49 = vadd.f32 %v2644_v7, %v2632_v40  ;;  %v5212_v40 = vld [vmem:[#allocation10 + $0x20] sm:$0xff] }
 0x1a0   :  { %3131 = vmatpush.bf16.msrb.mxu1 %v5184_v20  ;;  %v2657_v36 = vpop.f32.mrf.mxu1 }
 0x1a1   :  { %3119 = vmatmul.bf16.vlgmr.msrb.gmra.mxu0 %v2847_v33  ;;  %3144 = vmatpush.bf16.msrb.mxu2 %v5192_v39  ;;  %v2658_v5 = vadd.f32 %v2657_v36, %v2645_v49  ;;  %v5227_v39 = vld [vmem:[#allocation9] ss:$0 sm:$0xff] }
 0x1a2   :  { %3157 = vmatpush.bf16.msrb.mxu3 %v5200_v2  ;;  %3233 = vmatpush.bf16.msra.mxu0 %v5215_v46  ;;  %v5211_v49 = vld [vmem:[#allocation10 + $0x18] sm:$0xff] }
 0x1a3   :  { %3132 = vmatmul.bf16.vlgmr.msrb.gmra.mxu1 %v2848_v26 }
 0x1a6   :  { %v2670_v41 = vpop.f32.mrf.mxu2  ;;  %v2646_v43 = vpop.f32.mrf.mxu0 }
 0x1a7   :  { %v2671_v50 = vadd.f32 %v2670_v41, %v2658_v5  ;;  %v5210_v5 = vld [vmem:[#allocation10 + $0x10] sm:$0xff] }
 0x1a8   :  { %v2659_v45 = vpop.f32.mrf.mxu1 }
 0x1a9   :  { %v2683_v42 = vpop.f32.mrf.mxu3 }
 0x1aa   :  { %v2684_v51 = vadd.f32 %v2683_v42, %v2671_v50 }
 0x1ae   :  { %v2672_v47 = vpop.f32.mrf.mxu2 }
 0x1af   :  { %v5214_v47 = vld [vmem:[#allocation10 + $0x30] sm:$0xff] }
 0x1b0   :  { %3234 = vmatpush.bf16.msra.mxu0 %v5214_v47 }
 0x1b1   :  { %v2685_v48 = vpop.f32.mrf.mxu3 }
 0x1b2   :  { %v5213_v48 = vld [vmem:[#allocation10 + $0x28] sm:$0xff] }
 0x1b4   :  { %3235 = vmatpush.bf16.msra.mxu0 %v5213_v48 }
 0x1b8   :  { %3236 = vmatpush.bf16.msra.mxu0 %v5212_v40 }
 0x1bc   :  { %3237 = vmatpush.bf16.msra.mxu0 %v5211_v49 }
 0x1be   :  { %v2696_v52 = vpop.f32.mrf.mxu0 }
 0x1bf   :  { %v2697_v12 = vadd.f32 %v2696_v52, %v2684_v51 }
 0x1c0   :  { %v2709_v15 = vpop.f32.mrf.mxu1  ;;  %3238 = vmatpush.bf16.msra.mxu0 %v5210_v5 }
 0x1c1   :  { %v2845_v34 = vmax.f32 %v2697_v12, 0.0  ;;  %v2710_v22 = vadd.f32 %v2709_v15, %v506_v38  ;;  %v5209_v12 = vld [vmem:[#allocation10 + $0x8] sm:$0xff]  ;;  %v5208_v15 = vld [vmem:[#allocation10] sm:$0xff] }
 0x1c3   :  { %v2849_v54 = vpack.c.bf16 %v2845_v34, %v2845_v34 }
 0x1c4   :  { %3239 = vmatpush.bf16.msra.mxu0 %v5209_v12 }
 0x1c5   :  { %3145 = vmatmul.bf16.vlgmr.msrb.gmra.mxu2 %v2849_v54 }
 0x1c6   :  { %v2722_v37 = vpop.f32.mrf.mxu2  ;;  %v2698_v8 = vpop.f32.mrf.mxu0 }
 0x1c7   :  { %v2723_v0 = vadd.f32 %v2722_v37, %v2710_v22  ;;  %v5228_v8 = vld [vmem:[#allocation12] ss:$0 sm:$0xff] }
 0x1c8   :  { %v2711_v9 = vpop.f32.mrf.mxu1  ;;  %3240 = vmatpush.bf16.msra.mxu0 %v5208_v15 }
 0x1c9   :  { %v2735_v25 = vpop.f32.mrf.mxu3 }
 0x1ca   :  { %v2736_v27 = vadd.f32 %v2735_v25, %v2723_v0 }
 0x1ce   :  { %v2724_v58 = vpop.f32.mrf.mxu2 }
 0x1d1   :  { %v2737_v59 = vpop.f32.mrf.mxu3 }
 0x1de   :  { %v2748_v17 = vpop.f32.mrf.mxu0 }
 0x1df   :  { %v2749_v11 = vadd.f32 %v2748_v17, %v2736_v27 }
 0x1e0   :  { %v2761_v10 = vpop.f32.mrf.mxu1 }
 0x1e1   :  { %v2762_v14 = vadd.f32 %v2761_v10, %v2749_v11 }
 0x1e6   :  { %v2774_v21 = vpop.f32.mrf.mxu2  ;;  %v2750_v1 = vpop.f32.mrf.mxu0 }
 0x1e7   :  { %v2775_v16 = vadd.f32 %v2774_v21, %v2762_v14 }
 0x1e8   :  { %v2763_v3 = vpop.f32.mrf.mxu1 }
 0x1e9   :  { %v2787_v32 = vpop.f32.mrf.mxu3 }
 0x1ea   :  { %v2788_v18 = vadd.f32 %v2787_v32, %v2775_v16 }
 0x1ee   :  { %v2776_v4 = vpop.f32.mrf.mxu2 }
 0x1f1   :  { %v2789_v6 = vpop.f32.mrf.mxu3 }
 0x1fe   :  { %v2800_v19 = vpop.f32.mrf.mxu0 }
 0x1ff   :  { %v2801_v23 = vadd.f32 %v2800_v19, %v2788_v18 }
 0x200   :  { %v2813_v20 = vpop.f32.mrf.mxu1 }
 0x201   :  { %v2814_v24 = vadd.f32 %v2813_v20, %v2801_v23 }
 0x206   :  { %v2826_v33 = vpop.f32.mrf.mxu2  ;;  %v2802_v29 = vpop.f32.mrf.mxu0 }
 0x207   :  { %v2827_v53 = vadd.f32 %v2826_v33, %v2814_v24  ;;  %v2839_v26 = vpop.f32.mrf.mxu3 }
 0x208   :  { %v2815_v30 = vpop.f32.mrf.mxu1 }
 0x209   :  { %v2840_v55 = vadd.f32 %v2839_v26, %v2827_v53 }
 0x20b   :  { %v2846_v31 = vmax.f32 %v2840_v55, 0.0 }
 0x20d   :  { %v2850_v7 = vpack.c.bf16 %v2846_v31, %v2846_v31 }
 0x20e   :  { %v2828_v35 = vpop.f32.mrf.mxu2 }
 0x20f   :  { %v2841_v36 = vpop.f32.mrf.mxu3  ;;  %3158 = vmatmul.bf16.vlgmr.msrb.gmra.mxu3 %v2850_v7 }
 0x21e   :  { %v3120_v28 = vpop.f32.mrf.mxu0 }
 0x21f   :  { %v3121_v41 = vadd.f32 %v5227_v39, %v3120_v28 }
 0x220   :  { %v3133_v42 = vpop.f32.mrf.mxu1 }
 0x221   :  { %v3134_v43 = vadd.f32 %v3133_v42, %v3121_v41 }
 0x226   :  { %v3122_v44 = vpop.f32.mrf.mxu0 }
 0x228   :  { %v3135_v45 = vpop.f32.mrf.mxu1 }
 0x248   :  { %v3146_v50 = vpop.f32.mrf.mxu2 }
 0x249   :  { %v3147_v51 = vadd.f32 %v3146_v50, %v3134_v43 }
 0x250   :  { %v3148_v52 = vpop.f32.mrf.mxu2 }
 0x292   :  { %v3159_v34 = vpop.f32.mrf.mxu3 }
 0x293   :  { %v3160_v54 = vadd.f32 %v3159_v34, %v3147_v51 }
 0x295   :  { %v3163_v37 = vmax.f32 %v3160_v54, 0.0 }
 0x297   :  { %v3164_v25 = vpack.c.bf16 %v3163_v37, %v3163_v37 }
 0x299   :  { %3241 = vmatmul.bf16.vlgmr.msra.gmra.mxu0 %v3164_v25 }
 0x29a   :  { %v3161_v56 = vpop.f32.mrf.mxu3 }
 0x316   :  { %v3242_v57 = vpop.f32.mrf.mxu0 }
 0x317   :  { %v3243_v9 = vadd.f32 %v5228_v8, %v3242_v57 }
 0x319   :  { %v3246_v13 = vpack.c.bf16 %v3243_v9, %v3243_v9 }
 0x31b   :  { %3247 = vst [vmem:[%s5588_s7] sm:$0xf] %v3246_v13 }
 0x31e   :  { %v3244_v58 = vpop.f32.mrf.mxu0 }
 0x31f   :  { %3252 = vsyncpa [#allocation3], 1 }
 0x320   :  { %3253 = vsyncpa [#allocation5], 1 }
 0x321   :  { %3254 = vsyncpa [#allocation8], 1 }
 0x322   :  { %3255 = vsyncpa [#allocation11], 1 }

</bundles_post_ra>
